<compile_context>
chip_gen: v6e
topology: v6e:2x2x1
jax: 0.10.0
libtpu: 0.0.40
codegen_flags: <defaults>
</compile_context>

<pallas_src>
import functools

import jax
import jax.numpy as jnp
from jax.experimental import pallas as pl
from jax.experimental.pallas import tpu as pltpu


# --------------------------------------------------------------------------------------
# Fused unit_gcn kernel
# --------------------------------------------------------------------------------------

def _unit_gcn_kernel(x_ref, w_ref, b_ref, aeff_t_ref, ps_ref, pb_ref, o_ref, big_ref,
                     *, B, T, V, inter, cout, res_from_matmul):
    # One fused bf16 MXU matmul for all 1x1 convs of all 3 subsets (+ down/identity residual),
    # f32 accumulation, conv_a/conv_b biases added, staged in VMEM scratch.
    big_ref[...] = (jnp.dot(x_ref[...], w_ref[...], preferred_element_type=jnp.float32)
                    + b_ref[...])

    ga = T * inter                         # column width of one conv_a / conv_b group
    gd = T * cout                          # column width of one conv_d / residual group
    off_b, off_d, off_r = 3 * ga, 6 * ga, 6 * ga + 3 * gd
    inv_kt = 1.0 / float(inter * T)
    ps = ps_ref[...]                       # (1, T*cout) BN scale, lanes (t, co)
    pb = pb_ref[...]                       # (1, T*cout) folded biases

    # Attention + graph mixing + epilogue per sample; statically unrolled loop keeps live
    # ranges to ~one sample (equivalent to lax.fori_loop(..., unroll=True) for static B).
    for s in range(B):
        r0 = s * V
        y_s = None
        for i in range(3):                 # num_subset = 3, unrolled
            a_s = big_ref[r0:r0 + V, i * ga:(i + 1) * ga]                    # (V, T*inter)
            b_s = big_ref[r0:r0 + V, off_b + i * ga:off_b + (i + 1) * ga]    # (V, T*inter)
            # S^T[v2, v1] = sum_{t,c} b[t,v2,c] * a[t,v1,c], then / (inter*T)
            s_t = jax.lax.dot_general(b_s, a_s, (((1,), (1,)), ((), ())),
                                      preferred_element_type=jnp.float32) * inv_kt
            # softmax over v1 (= dim -2 of S = last dim of S^T)
            s_t = s_t - jnp.max(s_t, axis=-1, keepdims=True)
            e = jnp.exp(s_t)
            p_t = e * pl.reciprocal(jnp.sum(e, axis=-1, keepdims=True), approx=True)
            attn_t = p_t + aeff_t_ref[i]                                     # (A1soft + A)^T
            # graph mixing with conv_d already applied (linear ops commute):
            xd_s = big_ref[r0:r0 + V, off_d + i * gd:off_d + (i + 1) * gd]   # (V, T*cout)
            y_i = jnp.dot(attn_t, xd_s, preferred_element_type=jnp.float32)  # (V, T*cout)
            y_s = y_i if y_s is None else y_s + y_i

        if res_from_matmul:
            d_s = big_ref[r0:r0 + V, off_r:off_r + gd]     # BN-folded down conv (or identity)
        else:
            d_s = x_ref[r0:r0 + V, :].astype(jnp.float32)  # identity residual (cin == cout)

        # Epilogue: BN scale/bias (+ folded conv_d & down biases) + residual + ReLU, one store.
        o_ref[r0:r0 + V, :] = jnp.maximum(y_s * ps + pb + d_s, 0.0)


def _pick_batch_block(n, max_b=8):
    """Largest divisor of n <= max_b, preferring >=2 grid steps (v7x megacore)."""
    divs = [b for b in range(1, min(n, max_b) + 1) if n % b == 0]
    multi = [b for b in divs if n // b >= 2]
    return max(multi) if multi else max(divs)


@jax.jit
def unit_gcn_forward(params, x, A):
    """unit_gcn forward. x: (N, C, T, V) NCHW like PyTorch; A: (3, V, V). Returns (N, Cout, T, V).

    Parameter folding (block-diagonal weight, BN folding) lives under this jit for a
    self-contained test; in a real stacked model fold once and keep x v-major between layers.
    """
    N, cin, T, V = x.shape
    inter = params['Wa'].shape[-1]
    cout = params['Wd'].shape[-1]
    eps = 1e-5
    has_down = params['down_W'] is not None

    # Pad cin so the v-major lane axis (t, c) is 8-aligned (and 128-aligned when cheap).
    cin_pad = -(-cin // 8) * 8
    bump = cin_pad
    while (T * bump) % 128 != 0 and bump < cin_pad + 128:
        bump += 8
    if (T * bump) % 128 == 0:
        cin_pad = bump
    res_from_matmul = has_down or (cin_pad != cin)

    f32 = jnp.float32
    eye_t = jnp.eye(T, dtype=f32)

    def tblock(w):                          # (cin, width) -> block-diag over t (T*cin_pad, T*width)
        w = jnp.pad(w.astype(f32), ((0, cin_pad - cin), (0, 0)))
        return jnp.kron(eye_t, w)

    # ---- fold everything into one weight: columns [a0 a1 a2 | b0 b1 b2 | d0 d1 d2 | res] ----
    cols = ([tblock(params['Wa'][i]) for i in range(3)]
            + [tblock(params['Wb'][i]) for i in range(3)]
            + [tblock(params['Wd'][i]) for i in range(3)])
    bias = ([jnp.tile(params['ba'][i], T) for i in range(3)]
            + [jnp.tile(params['bb'][i], T) for i in range(3)]
            + [jnp.zeros((3 * T * cout,), f32)])

    bn_s = params['bn_gamma'] / jnp.sqrt(params['bn_var'] + eps)
    bn_b = params['bn_beta'] - params['bn_mean'] * bn_s
    post_bias = bn_s * jnp.sum(params['bd'], axis=0) + bn_b       # conv_d biases folded post-mix

    if has_down:
        dn_s = params['down_gamma'] / jnp.sqrt(params['down_var'] + eps)
        dn_b = params['down_beta'] - params['down_mean'] * dn_s
        cols.append(tblock(params['down_W'] * dn_s[None, :]))     # BN scale folded into weight
        post_bias = post_bias + params['down_b'] * dn_s + dn_b
    elif res_from_matmul:                                          # identity residual via matmul
        cols.append(tblock(jnp.eye(cin, cout, dtype=f32)))
    if res_from_matmul:
        bias.append(jnp.zeros((T * cout,), f32))

    w_big = jnp.concatenate(cols, axis=1).astype(jnp.bfloat16)     # (T*cin_pad, total_cols)
    b_big = jnp.concatenate(bias).reshape(1, -1)                   # (1, total_cols), f32
    ps = jnp.tile(bn_s, T).reshape(1, T * cout)                    # lane index = t*cout + co
    pb = jnp.tile(post_bias, T).reshape(1, T * cout)
    aeff_t = jnp.transpose(A + params['PA'], (0, 2, 1))            # (3, V, V), pre-transposed

    # ---- NCHW -> v-major: rows (n, v), lanes (t, c); done once at the jit boundary ----
    x_v = jnp.transpose(x, (0, 3, 2, 1))                           # (N, V, T, cin)
    if cin_pad != cin:
        x_v = jnp.pad(x_v, ((0, 0), (0, 0), (0, 0), (0, cin_pad - cin)))
    x_v = x_v.reshape(N * V, T * cin_pad).astype(jnp.bfloat16)

    B = _pick_batch_block(N)
    total_cols = w_big.shape[1]
    kernel = functools.partial(_unit_gcn_kernel, B=B, T=T, V=V, inter=inter,
                               cout=cout, res_from_matmul=res_from_matmul)
    out = pl.pallas_call(
        kernel,
        grid=(N // B,),
        in_specs=[
            pl.BlockSpec((B * V, T * cin_pad), lambda n: (n, 0)),
            pl.BlockSpec((T * cin_pad, total_cols), lambda n: (0, 0)),
            pl.BlockSpec((1, total_cols), lambda n: (0, 0)),
            pl.BlockSpec((3, V, V), lambda n: (0, 0, 0)),
            pl.BlockSpec((1, T * cout), lambda n: (0, 0)),
            pl.BlockSpec((1, T * cout), lambda n: (0, 0)),
        ],
        out_specs=pl.BlockSpec((B * V, T * cout), lambda n: (n, 0)),
        out_shape=jax.ShapeDtypeStruct((N * V, T * cout), jnp.float32),
        scratch_shapes=[pltpu.VMEM((B * V, total_cols), jnp.float32)],
        compiler_params=pltpu.CompilerParams(dimension_semantics=("parallel",)),
    )(x_v, w_big, b_big, aeff_t, ps, pb)

    # v-major (N*V, T*cout) -> NCHW (N, cout, T, V); drop this in a stacked v-major model.
    return jnp.transpose(out.reshape(N, V, T, cout), (0, 3, 2, 1))


# --------------------------------------------------------------------------------------
# Pure-JAX reference mirroring the PyTorch forward (NCHW), inference-mode BN
# --------------------------------------------------------------------------------------

def unit_gcn_reference(params, x, A):
    N, C, T, V = x.shape
    inter = params['Wa'].shape[-1]
    eps = 1e-5
    A_eff = A + params['PA']
    y = None
    for i in range(3):
        a = jnp.einsum('nctv,cd->ndtv', x, params['Wa'][i]) + params['ba'][i][None, :, None, None]
        b = jnp.einsum('nctv,cd->ndtv', x, params['Wb'][i]) + params['bb'][i][None, :, None, None]
        A1 = jnp.transpose(a, (0, 3, 1, 2)).reshape(N, V, inter * T)
        A2 = b.reshape(N, inter * T, V)
        attn = jax.nn.softmax(jnp.matmul(A1, A2) / float(inter * T), axis=-2) + A_eff[i]
        z = jnp.matmul(x.reshape(N, C * T, V), attn).reshape(N, C, T, V)
        z = jnp.einsum('nctv,cd->ndtv', z, params['Wd'][i]) + params['bd'][i][None, :, None, None]
        y = z if y is None else y + z
    bn_s = params['bn_gamma'] / jnp.sqrt(params['bn_var'] + eps)
    bn_b = params['bn_beta'] - params['bn_mean'] * bn_s
    y = y * bn_s[None, :, None, None] + bn_b[None, :, None, None]
    if params['down_W'] is not None:
        d = jnp.einsum('nctv,cd->ndtv', x, params['down_W']) + params['down_b'][None, :, None, None]
        ds = params['down_gamma'] / jnp.sqrt(params['down_var'] + eps)
        db = params['down_beta'] - params['down_mean'] * ds
        d = d * ds[None, :, None, None] + db[None, :, None, None]
    else:
        d = x
    return jnp.maximum(y + d, 0.0)


# --------------------------------------------------------------------------------------
# Deterministic parameter initialization (shapes follow the PyTorch __init__; conv weights
# stored channels-last as (Cin, Cout)). BN uses nontrivial inference statistics so the
# numerical check exercises the full main branch (the PyTorch init's bn gamma=1e-6 would
# make it numerically invisible).
# --------------------------------------------------------------------------------------

def init_unit_gcn_params(key, cin, cout, V, coff_embedding=4):
    inter = cout // coff_embedding
    ks = jax.random.split(key, 16)

    def nrm(k, shape, std):
        return std * jax.random.normal(k, shape, dtype=jnp.float32)

    p = {
        'PA': jnp.full((3, V, V), 1e-6, jnp.float32),
        'Wa': nrm(ks[0], (3, cin, inter), (2.0 / inter) ** 0.5),
        'ba': 0.05 * jax.random.normal(ks[1], (3, inter), jnp.float32),
        'Wb': nrm(ks[2], (3, cin, inter), (2.0 / inter) ** 0.5),
        'bb': 0.05 * jax.random.normal(ks[3], (3, inter), jnp.float32),
        'Wd': nrm(ks[4], (3, cin, cout), (2.0 / (cout * cin * 3)) ** 0.5),
        'bd': 0.05 * jax.random.normal(ks[5], (3, cout), jnp.float32),
        'bn_gamma': 0.5 + jax.random.uniform(ks[6], (cout,), jnp.float32),
        'bn_beta': 0.1 * jax.random.normal(ks[7], (cout,), jnp.float32),
        'bn_mean': 0.1 * jax.random.normal(ks[8], (cout,), jnp.float32),
        'bn_var': 0.5 + jax.random.uniform(ks[9], (cout,), jnp.float32),
    }
    if cin != cout:
        p.update({
            'down_W': nrm(ks[10], (cin, cout), (2.0 / cout) ** 0.5),
            'down_b': 0.05 * jax.random.normal(ks[11], (cout,), jnp.float32),
            'down_gamma': 0.5 + jax.random.uniform(ks[12], (cout,), jnp.float32),
            'down_beta': 0.1 * jax.random.normal(ks[13], (cout,), jnp.float32),
            'down_mean': 0.1 * jax.random.normal(ks[14], (cout,), jnp.float32),
            'down_var': 0.5 + jax.random.uniform(ks[15], (cout,), jnp.float32),
        })
    else:
        p.update({'down_W': None, 'down_b': None, 'down_gamma': None,
                  'down_beta': None, 'down_mean': None, 'down_var': None})
    return p


# --------------------------------------------------------------------------------------

if __name__ == "__main__":
    key = jax.random.PRNGKey(0)
    N, T, V = 2, 8, 16
    # (in_channels, out_channels): first config exercises the conv+BN `down` path (and the
    # padded tiny-cin input), second exercises the identity residual.
    for cin, cout in ((3, 64), (64, 64)):
        key, kx, ka, kp = jax.random.split(key, 4)
        x = jax.random.normal(kx, (N, cin, T, V), dtype=jnp.float32)
        A = 0.1 * jax.random.uniform(ka, (3, V, V), dtype=jnp.float32)
        params = init_unit_gcn_params(kp, cin, cout, V)

        out = jax.block_until_ready(unit_gcn_forward(params, x, A))
        assert out.shape == (N, cout, T, V)
        assert bool(jnp.all(jnp.isfinite(out)))

        ref = jax.block_until_ready(unit_gcn_reference(params, x, A))
        err = float(jnp.max(jnp.abs(out - ref)))
        tol = 3e-2 * (float(jnp.max(jnp.abs(ref))) + 1.0)
        assert err <= tol, f"cin={cin} cout={cout}: max|diff|={err} > tol={tol}"

    print("KERNEL_OK")
</pallas_src>

<mosaic_0001>
module attributes {stable_mosaic.version = 11 : i64} {
  func.func @_unit_gcn_kernel(%arg0: i32, %arg1: memref<16x128xbf16, #tpu.memory_space<vmem>>, %arg2: memref<128x2816xbf16, #tpu.memory_space<vmem>>, %arg3: memref<1x2816xf32, #tpu.memory_space<vmem>>, %arg4: memref<3x16x16xf32, #tpu.memory_space<vmem>>, %arg5: memref<1x512xf32, #tpu.memory_space<vmem>>, %arg6: memref<1x512xf32, #tpu.memory_space<vmem>>, %arg7: memref<16x512xf32, #tpu.memory_space<vmem>>, %arg8: memref<16x2816xf32, #tpu.memory_space<vmem>>) attributes {dimension_semantics = [#tpu.dimension_semantics<parallel>], iteration_bounds = array<i64: 2>, scalar_prefetch = 0 : i64, scratch_operands = 1 : i64, tpu.core_type = #tpu.core_type<tc>, window_params = [{transform_indices = @transform_0, window_bounds = array<i64: 16, 128>}, {pipeline_mode = #tpu.pipeline_mode<synchronous>, transform_indices = @transform_1, window_bounds = array<i64: 128, 2816>}, {pipeline_mode = #tpu.pipeline_mode<synchronous>, transform_indices = @transform_2, window_bounds = array<i64: 1, 2816>}, {pipeline_mode = #tpu.pipeline_mode<synchronous>, transform_indices = @transform_3, window_bounds = array<i64: 3, 16, 16>}, {pipeline_mode = #tpu.pipeline_mode<synchronous>, transform_indices = @transform_4, window_bounds = array<i64: 1, 512>}, {pipeline_mode = #tpu.pipeline_mode<synchronous>, transform_indices = @transform_5, window_bounds = array<i64: 1, 512>}, {transform_indices = @transform_6, window_bounds = array<i64: 16, 512>}]} {
    %c0 = arith.constant 0 : index
    %c0_0 = arith.constant 0 : index
    %0 = vector.load %arg1[%c0, %c0_0] : memref<16x128xbf16, #tpu.memory_space<vmem>>, vector<16x128xbf16>
    %c0_1 = arith.constant 0 : index
    %c0_2 = arith.constant 0 : index
    %1 = vector.load %arg2[%c0_1, %c0_2] : memref<128x2816xbf16, #tpu.memory_space<vmem>>, vector<128x2816xbf16>
    %cst = arith.constant dense<0.000000e+00> : vector<16x2816xf32>
    %2 = tpu.matmul %0, %1, %cst {dimension_numbers = #tpu.dot_dimension_numbers<[1], [0], [0], [1], [0, 0, 1, 1], [], []>} : vector<16x128xbf16>, vector<128x2816xbf16>, vector<16x2816xf32> -> vector<16x2816xf32>
    %c0_3 = arith.constant 0 : index
    %c0_4 = arith.constant 0 : index
    %3 = vector.load %arg3[%c0_3, %c0_4] : memref<1x2816xf32, #tpu.memory_space<vmem>>, vector<1x2816xf32>
    %4 = vector.broadcast %3 : vector<1x2816xf32> to vector<16x2816xf32>
    %5 = arith.addf %2, %4 : vector<16x2816xf32>
    %c0_5 = arith.constant 0 : index
    %c0_6 = arith.constant 0 : index
    %6 = vector.load %arg8[%c0_5, %c0_6] : memref<16x2816xf32, #tpu.memory_space<vmem>>, vector<16x2816xf32>
    tpu.vector_store %arg8[%c0_5, %c0_6], %5 {strides = array<i32>} : memref<16x2816xf32, #tpu.memory_space<vmem>>, vector<16x2816xf32>,
    %c0_7 = arith.constant 0 : index
    %c0_8 = arith.constant 0 : index
    %7 = vector.load %arg5[%c0_7, %c0_8] : memref<1x512xf32, #tpu.memory_space<vmem>>, vector<1x512xf32>
    %c0_9 = arith.constant 0 : index
    %c0_10 = arith.constant 0 : index
    %8 = vector.load %arg6[%c0_9, %c0_10] : memref<1x512xf32, #tpu.memory_space<vmem>>, vector<1x512xf32>
    %c0_11 = arith.constant 0 : index
    %c0_12 = arith.constant 0 : index
    %9 = vector.load %arg8[%c0_11, %c0_12] : memref<16x2816xf32, #tpu.memory_space<vmem>>, vector<16x128xf32>
    %c0_13 = arith.constant 0 : index
    %c384 = arith.constant 384 : index
    %10 = vector.load %arg8[%c0_13, %c384] : memref<16x2816xf32, #tpu.memory_space<vmem>>, vector<16x128xf32>
    %cst_14 = arith.constant dense<0.000000e+00> : vector<16x16xf32>
    %11 = tpu.matmul %10, %9, %cst_14 {dimension_numbers = #tpu.dot_dimension_numbers<[1], [1], [0], [0], [0, 0, 1, 0], [], []>} : vector<16x128xf32>, vector<16x128xf32>, vector<16x16xf32> -> vector<16x16xf32>
    %cst_15 = arith.constant 7.812500e-03 : f32
    %12 = vector.broadcast %cst_15 : f32 to vector<16x16xf32>
    %13 = arith.mulf %11, %12 : vector<16x16xf32>
    %cst_16 = arith.constant dense<0xFF800000> : vector<16xf32>
    %14 = vector.multi_reduction <maximumf>, %13, %cst_16 [1] : vector<16x16xf32> to vector<16xf32>
    %15 = vector.shape_cast %14 : vector<16xf32> to vector<16x1xf32>
    %16 = vector.broadcast %15 : vector<16x1xf32> to vector<16x16xf32>
    %17 = arith.subf %13, %16 : vector<16x16xf32>
    %18 = math.exp %17 : vector<16x16xf32>
    %cst_17 = arith.constant dense<0.000000e+00> : vector<16xf32>
    %19 = vector.multi_reduction <add>, %18, %cst_17 [1] : vector<16x16xf32> to vector<16xf32>
    %20 = vector.shape_cast %19 : vector<16xf32> to vector<16x1xf32>
    %21 = tpu.reciprocal %20 {approx = true} : vector<16x1xf32> -> vector<16x1xf32>
    %22 = vector.broadcast %21 : vector<16x1xf32> to vector<16x16xf32>
    %23 = arith.mulf %18, %22 : vector<16x16xf32>
    %c0_18 = arith.constant 0 : index
    %c0_19 = arith.constant 0 : index
    %c0_20 = arith.constant 0 : index
    %24 = vector.load %arg4[%c0_18, %c0_19, %c0_20] : memref<3x16x16xf32, #tpu.memory_space<vmem>>, vector<1x16x16xf32>
    %25 = vector.shape_cast %24 : vector<1x16x16xf32> to vector<16x16xf32>
    %26 = arith.addf %23, %25 : vector<16x16xf32>
    %c0_21 = arith.constant 0 : index
    %c768 = arith.constant 768 : index
    %27 = vector.load %arg8[%c0_21, %c768] : memref<16x2816xf32, #tpu.memory_space<vmem>>, vector<16x512xf32>
    %cst_22 = arith.constant dense<0.000000e+00> : vector<16x512xf32>
    %28 = tpu.matmul %26, %27, %cst_22 {dimension_numbers = #tpu.dot_dimension_numbers<[1], [0], [0], [1], [0, 0, 1, 1], [], []>} : vector<16x16xf32>, vector<16x512xf32>, vector<16x512xf32> -> vector<16x512xf32>
    %c0_23 = arith.constant 0 : index
    %c128 = arith.constant 128 : index
    %29 = vector.load %arg8[%c0_23, %c128] : memref<16x2816xf32, #tpu.memory_space<vmem>>, vector<16x128xf32>
    %c0_24 = arith.constant 0 : index
    %c512 = arith.constant 512 : index
    %30 = vector.load %arg8[%c0_24, %c512] : memref<16x2816xf32, #tpu.memory_space<vmem>>, vector<16x128xf32>
    %cst_25 = arith.constant dense<0.000000e+00> : vector<16x16xf32>
    %31 = tpu.matmul %30, %29, %cst_25 {dimension_numbers = #tpu.dot_dimension_numbers<[1], [1], [0], [0], [0, 0, 1, 0], [], []>} : vector<16x128xf32>, vector<16x128xf32>, vector<16x16xf32> -> vector<16x16xf32>
    %cst_26 = arith.constant 7.812500e-03 : f32
    %32 = vector.broadcast %cst_26 : f32 to vector<16x16xf32>
    %33 = arith.mulf %31, %32 : vector<16x16xf32>
    %cst_27 = arith.constant dense<0xFF800000> : vector<16xf32>
    %34 = vector.multi_reduction <maximumf>, %33, %cst_27 [1] : vector<16x16xf32> to vector<16xf32>
    %35 = vector.shape_cast %34 : vector<16xf32> to vector<16x1xf32>
    %36 = vector.broadcast %35 : vector<16x1xf32> to vector<16x16xf32>
    %37 = arith.subf %33, %36 : vector<16x16xf32>
    %38 = math.exp %37 : vector<16x16xf32>
    %cst_28 = arith.constant dense<0.000000e+00> : vector<16xf32>
    %39 = vector.multi_reduction <add>, %38, %cst_28 [1] : vector<16x16xf32> to vector<16xf32>
    %40 = vector.shape_cast %39 : vector<16xf32> to vector<16x1xf32>
    %41 = tpu.reciprocal %40 {approx = true} : vector<16x1xf32> -> vector<16x1xf32>
    %42 = vector.broadcast %41 : vector<16x1xf32> to vector<16x16xf32>
    %43 = arith.mulf %38, %42 : vector<16x16xf32>
    %c1 = arith.constant 1 : index
    %c0_29 = arith.constant 0 : index
    %c0_30 = arith.constant 0 : index
    %44 = vector.load %arg4[%c1, %c0_29, %c0_30] : memref<3x16x16xf32, #tpu.memory_space<vmem>>, vector<1x16x16xf32>
    %45 = vector.shape_cast %44 : vector<1x16x16xf32> to vector<16x16xf32>
    %46 = arith.addf %43, %45 : vector<16x16xf32>
    %c0_31 = arith.constant 0 : index
    %c1280 = arith.constant 1280 : index
    %47 = vector.load %arg8[%c0_31, %c1280] : memref<16x2816xf32, #tpu.memory_space<vmem>>, vector<16x512xf32>
    %cst_32 = arith.constant dense<0.000000e+00> : vector<16x512xf32>
    %48 = tpu.matmul %46, %47, %cst_32 {dimension_numbers = #tpu.dot_dimension_numbers<[1], [0], [0], [1], [0, 0, 1, 1], [], []>} : vector<16x16xf32>, vector<16x512xf32>, vector<16x512xf32> -> vector<16x512xf32>
    %49 = arith.addf %28, %48 : vector<16x512xf32>
    %c0_33 = arith.constant 0 : index
    %c256 = arith.constant 256 : index
    %50 = vector.load %arg8[%c0_33, %c256] : memref<16x2816xf32, #tpu.memory_space<vmem>>, vector<16x128xf32>
    %c0_34 = arith.constant 0 : index
    %c640 = arith.constant 640 : index
    %51 = vector.load %arg8[%c0_34, %c640] : memref<16x2816xf32, #tpu.memory_space<vmem>>, vector<16x128xf32>
    %cst_35 = arith.constant dense<0.000000e+00> : vector<16x16xf32>
    %52 = tpu.matmul %51, %50, %cst_35 {dimension_numbers = #tpu.dot_dimension_numbers<[1], [1], [0], [0], [0, 0, 1, 0], [], []>} : vector<16x128xf32>, vector<16x128xf32>, vector<16x16xf32> -> vector<16x16xf32>
    %cst_36 = arith.constant 7.812500e-03 : f32
    %53 = vector.broadcast %cst_36 : f32 to vector<16x16xf32>
    %54 = arith.mulf %52, %53 : vector<16x16xf32>
    %cst_37 = arith.constant dense<0xFF800000> : vector<16xf32>
    %55 = vector.multi_reduction <maximumf>, %54, %cst_37 [1] : vector<16x16xf32> to vector<16xf32>
    %56 = vector.shape_cast %55 : vector<16xf32> to vector<16x1xf32>
    %57 = vector.broadcast %56 : vector<16x1xf32> to vector<16x16xf32>
    %58 = arith.subf %54, %57 : vector<16x16xf32>
    %59 = math.exp %58 : vector<16x16xf32>
    %cst_38 = arith.constant dense<0.000000e+00> : vector<16xf32>
    %60 = vector.multi_reduction <add>, %59, %cst_38 [1] : vector<16x16xf32> to vector<16xf32>
    %61 = vector.shape_cast %60 : vector<16xf32> to vector<16x1xf32>
    %62 = tpu.reciprocal %61 {approx = true} : vector<16x1xf32> -> vector<16x1xf32>
    %63 = vector.broadcast %62 : vector<16x1xf32> to vector<16x16xf32>
    %64 = arith.mulf %59, %63 : vector<16x16xf32>
    %c2 = arith.constant 2 : index
    %c0_39 = arith.constant 0 : index
    %c0_40 = arith.constant 0 : index
    %65 = vector.load %arg4[%c2, %c0_39, %c0_40] : memref<3x16x16xf32, #tpu.memory_space<vmem>>, vector<1x16x16xf32>
    %66 = vector.shape_cast %65 : vector<1x16x16xf32> to vector<16x16xf32>
    %67 = arith.addf %64, %66 : vector<16x16xf32>
    %c0_41 = arith.constant 0 : index
    %c1792 = arith.constant 1792 : index
    %68 = vector.load %arg8[%c0_41, %c1792] : memref<16x2816xf32, #tpu.memory_space<vmem>>, vector<16x512xf32>
    %cst_42 = arith.constant dense<0.000000e+00> : vector<16x512xf32>
    %69 = tpu.matmul %67, %68, %cst_42 {dimension_numbers = #tpu.dot_dimension_numbers<[1], [0], [0], [1], [0, 0, 1, 1], [], []>} : vector<16x16xf32>, vector<16x512xf32>, vector<16x512xf32> -> vector<16x512xf32>
    %70 = arith.addf %49, %69 : vector<16x512xf32>
    %c0_43 = arith.constant 0 : index
    %c2304 = arith.constant 2304 : index
    %71 = vector.load %arg8[%c0_43, %c2304] : memref<16x2816xf32, #tpu.memory_space<vmem>>, vector<16x512xf32>
    %72 = vector.broadcast %7 : vector<1x512xf32> to vector<16x512xf32>
    %73 = arith.mulf %70, %72 : vector<16x512xf32>
    %74 = vector.broadcast %8 : vector<1x512xf32> to vector<16x512xf32>
    %75 = arith.addf %73, %74 : vector<16x512xf32>
    %76 = arith.addf %75, %71 : vector<16x512xf32>
    %cst_44 = arith.constant 0.000000e+00 : f32
    %77 = vector.broadcast %cst_44 : f32 to vector<16x512xf32>
    %78 = arith.maximumf %76, %77 : vector<16x512xf32>
    %c0_45 = arith.constant 0 : index
    %c0_46 = arith.constant 0 : index
    %79 = vector.load %arg7[%c0_45, %c0_46] : memref<16x512xf32, #tpu.memory_space<vmem>>, vector<16x512xf32>
    tpu.vector_store %arg7[%c0_45, %c0_46], %78 {strides = array<i32>} : memref<16x512xf32, #tpu.memory_space<vmem>>, vector<16x512xf32>,
    return
  }
  func.func @transform_0(%arg0: i32) -> (i32, i32) {
    %c0_i32 = arith.constant 0 : i32
    %c0_i32_0 = arith.constant 0 : i32
    return %arg0, %c0_i32 : i32, i32
  }
  func.func @transform_1(%arg0: i32) -> (i32, i32) {
    %c0_i32 = arith.constant 0 : i32
    %c0_i32_0 = arith.constant 0 : i32
    %c0_i32_1 = arith.constant 0 : i32
    return %c0_i32, %c0_i32_0 : i32, i32
  }
  func.func @transform_2(%arg0: i32) -> (i32, i32) {
    %c0_i32 = arith.constant 0 : i32
    %c0_i32_0 = arith.constant 0 : i32
    %c0_i32_1 = arith.constant 0 : i32
    return %c0_i32, %c0_i32_0 : i32, i32
  }
  func.func @transform_3(%arg0: i32) -> (i32, i32, i32) {
    %c0_i32 = arith.constant 0 : i32
    %c0_i32_0 = arith.constant 0 : i32
    %c0_i32_1 = arith.constant 0 : i32
    %c0_i32_2 = arith.constant 0 : i32
    return %c0_i32, %c0_i32_0, %c0_i32_1 : i32, i32, i32
  }
  func.func @transform_4(%arg0: i32) -> (i32, i32) {
    %c0_i32 = arith.constant 0 : i32
    %c0_i32_0 = arith.constant 0 : i32
    %c0_i32_1 = arith.constant 0 : i32
    return %c0_i32, %c0_i32_0 : i32, i32
  }
  func.func @transform_5(%arg0: i32) -> (i32, i32) {
    %c0_i32 = arith.constant 0 : i32
    %c0_i32_0 = arith.constant 0 : i32
    %c0_i32_1 = arith.constant 0 : i32
    return %c0_i32, %c0_i32_0 : i32, i32
  }
  func.func @transform_6(%arg0: i32) -> (i32, i32) {
    %c0_i32 = arith.constant 0 : i32
    %c0_i32_0 = arith.constant 0 : i32
    return %arg0, %c0_i32 : i32, i32
  }
}

</mosaic_0001>

<bundles_post_ra>
// kernel: tile.66
= control target key start
LH: loop header
LB: loop body
LE: loop exit
PB: predicated region body
PF: predicated region fallthrough
CT: control target
= control target key end

     0   :  { %s22_s0 = inlined_call_operand.vmem [shape: f32[64], index: 0, kind: input, shape index: {}]   ;;  %s23_s1 = inlined_call_operand.vmem [shape: f32[8,64], index: 1, kind: output, shape index: {}]  }
   0x1   :  { %v4_v0 = vld [vmem:[%s22_s0] ss:$0 sm:$0xff] }
   0x2   :  { %5 = vst [vmem:[%s23_s1] sm:$0xff] %v4_v0 }

// kernel: tile.56
= control target key start
LH: loop header
LB: loop body
LE: loop exit
PB: predicated region body
PF: predicated region fallthrough
CT: control target
= control target key end

     0   :  { %s22_s0 = inlined_call_operand.vmem [shape: f32[16], index: 0, kind: input, shape index: {}]   ;;  %s23_s1 = inlined_call_operand.vmem [shape: f32[8,16], index: 1, kind: output, shape index: {}]  }
   0x1   :  { %v4_v0 = vld [vmem:[%s22_s0] ss:$0 sm:$0xff] }
   0x2   :  { %5 = vst [vmem:[%s23_s1] sm:$0xff] %v4_v0 }

// kernel: tile.57
= control target key start
LH: loop header
LB: loop body
LE: loop exit
PB: predicated region body
PF: predicated region fallthrough
CT: control target
= control target key end

     0   :  { %s69_s10 = smov 112   ;;  %s70_s11 = smov 80   ;;  %vm3_vm0 = vcmask 130048   ;;  %vm9_vm1 = vcmask 1048448   ;;  %vm15_vm2 = vcmask 917248   ;;  %vm21_vm3 = vcmask 786048   ;;  %s113_s0 = inlined_call_operand.vmem [shape: f32[8,16], index: 0, kind: input, shape index: {}]   ;;  %s114_s1 = inlined_call_operand.vmem [shape: f32[128], index: 1, kind: output, shape index: {}]  }
   0x1   :  { %v55_v0 = vld [vmem:[%s113_s0 + $0x7] sm:$0x1]   ;;  %v57_v1 = vld [vmem:[%s113_s0 + $0x5] sm:$0x1]   ;;  %v56_v2 = vld [vmem:[%s113_s0 + $0x6] sm:$0x1]  }
   0x2   :  { %7 = vrot.lane.b32.xlu0 %v55_v0, %s69_s10  ;;  %19 = vrot.lane.b32.xlu1 %v57_v1, %s70_s11  ;;  %v58_v3 = vld [vmem:[%s113_s0 + $0x4] sm:$0x1]   ;;  %v2_v4 = vld [vmem:[%s113_s0] sm:$0x1]   ;;  %s71_s18 = smov 96   ;;  %s72_s19 = smov 64  }
   0x3   :  { %4 = vst.msk [vmem:[#allocation0] sm:$0x1] %vm3_vm0, %v2_v4   ;;  %v59_v5 = vld [vmem:[%s113_s0 + $0x3] sm:$0x1]   ;;  %v60_v6 = vld [vmem:[%s113_s0 + $0x2] sm:$0x1]  }
   0x4   :  { %s73_s24 = smov 48   ;;  %s74_s25 = smov 32   ;;  %v61_v7 = vld [vmem:[%s113_s0 + $0x1] sm:$0x1]   ;;  %vm27_vm4 = vcmask 654848   ;;  %vm33_vm5 = vcmask 523648  }
   0x5   :  { %s75_s0 = smov 16   ;;  %vm39_vm6 = vcmask 392448   ;;  %vm45_vm7 = vcmask 261248  }
   0x6   :  { %13 = vrot.lane.b32.xlu0 %v56_v2, %s71_s18  ;;  %25 = vrot.lane.b32.xlu1 %v58_v3, %s72_s19 }
   0xa   :  { %31 = vrot.lane.b32.xlu0 %v59_v5, %s73_s24  ;;  %37 = vrot.lane.b32.xlu1 %v60_v6, %s74_s25 }
   0xe   :  { %43 = vrot.lane.b32.xlu0 %v61_v7, %s75_s0 }
  0x74   :  { %v8_v8 = vpop.permute.xlu0 %7   ;;  %v20_v9 = vpop.permute.xlu1 %19  }
  0x75   :  { %10 = vst.msk [vmem:[#allocation0] sm:$0x1] %vm9_vm1, %v8_v8  }
  0x78   :  { %v14_v10 = vpop.permute.xlu0 %13   ;;  %v26_v11 = vpop.permute.xlu1 %25  }
  0x79   :  { %16 = vst.msk [vmem:[#allocation0] sm:$0x1] %vm15_vm2, %v14_v10  }
  0x7a   :  { %22 = vst.msk [vmem:[#allocation0] sm:$0x1] %vm21_vm3, %v20_v9  }
  0x7b   :  { %28 = vst.msk [vmem:[#allocation0] sm:$0x1] %vm27_vm4, %v26_v11  }
  0x7c   :  { %v32_v12 = vpop.permute.xlu0 %31   ;;  %v38_v13 = vpop.permute.xlu1 %37  }
  0x7d   :  { %34 = vst.msk [vmem:[#allocation0] sm:$0x1] %vm33_vm5, %v32_v12  }
  0x7e   :  { %40 = vst.msk [vmem:[#allocation0] sm:$0x1] %vm39_vm6, %v38_v13  }
  0x80   :  { %v44_v14 = vpop.permute.xlu0 %43  }
  0x81   :  { %46 = vst.msk [vmem:[#allocation0] sm:$0x1] %vm45_vm7, %v44_v14  }
  0x88   :  { %v51_v15 = vld [vmem:[#allocation0] sm:$0x1] }
  0x89   :  { %54 = vst [vmem:[%s114_s1] sm:$0x1] %v51_v15 }

// kernel: tile.67
= control target key start
LH: loop header
LB: loop body
LE: loop exit
PB: predicated region body
PF: predicated region fallthrough
CT: control target
= control target key end

     0   :  { %vm3_vm0 = vcmask 523264   ;;  %s46_s8 = smov 64   ;;  %vm9_vm1 = vcmask 1048064   ;;  %s75_s0 = inlined_call_operand.vmem [shape: f32[8,64], index: 0, kind: input, shape index: {}]   ;;  %s76_s1 = inlined_call_operand.vmem [shape: f32[1,512], index: 1, kind: output, shape index: {}]  }
   0x1   :  { %v41_v0 = vld [vmem:[%s75_s0 + $0x1] ss:$2 sm:$0xf]   ;;  %v2_v1 = vld [vmem:[%s75_s0] ss:$2 sm:$0xf]  }
   0x2   :  { %7 = vrot.lane.b32.xlu0 %v41_v0, %s46_s8  ;;  %4 = vst.msk [vmem:[#allocation0] ss:$8 sm:$0xf] %vm3_vm0, %v2_v1  }
  0x74   :  { %v8_v2 = vpop.permute.xlu0 %7  }
  0x75   :  { %10 = vst.msk [vmem:[#allocation0] ss:$8 sm:$0xf] %vm9_vm1, %v8_v2  }
  0x7c   :  { %v15_v3 = vld [vmem:[#allocation0] sm:$0x1]  ;;  %v20_v4 = vld [vmem:[#allocation0 + $0x8] sm:$0x1]  ;;  %v26_v5 = vld [vmem:[#allocation0 + $0x10] sm:$0x1] }
  0x7d   :  { %18 = vst [vmem:[%s76_s1] sm:$0x1] %v15_v3  ;;  %42 = vst [vmem:[%s76_s1 + $0x1] sm:$0x1] %v20_v4  ;;  %v33_v6 = vld [vmem:[#allocation0 + $0x18] sm:$0x1] }
  0x7e   :  { %43 = vst [vmem:[%s76_s1 + $0x2] sm:$0x1] %v26_v5  ;;  %44 = vst [vmem:[%s76_s1 + $0x3] sm:$0x1] %v33_v6 }

// kernel: custom-call
= control target key start
LH: loop header
LB: loop body
LE: loop exit
PB: predicated region body
PF: predicated region fallthrough
CT: control target
= control target key end

     0   :  { %s6_s0 = inlined_call_operand.vmem [shape: f32[2816], index: 0, kind: output, shape index: {}]  }

// kernel: unit_gcn_forward.1
= control target key start
LH: loop header
LB: loop body
LE: loop exit
PB: predicated region body
PF: predicated region fallthrough
CT: control target
= control target key end

     0   :  { %s3524_s21 = smov 0   ;;  %s4338_s0 = inlined_call_operand.vmem [shape: bf16[32,128], index: 0, kind: input, shape index: {}]   ;;  %s4339_s1 = inlined_call_operand.vmem [shape: bf16[128,2816], index: 1, kind: input, shape index: {}]   ;;  %s4340_s2 = inlined_call_operand.vmem [shape: f32[1,2816], index: 2, kind: input, shape index: {}]   ;;  %s4341_s3 = inlined_call_operand.vmem [shape: f32[3,16,16], index: 3, kind: input, shape index: {}]   ;;  %s4342_s4 = inlined_call_operand.vmem [shape: f32[1,512], index: 4, kind: input, shape index: {}]   ;;  %s4343_s5 = inlined_call_operand.vmem [shape: f32[1,512], index: 5, kind: input, shape index: {}]   ;;  %s4344_s6 = inlined_call_operand.vmem [shape: f32[32,512], index: 6, kind: output, shape index: {}]  }
   0x1 LB: > { %s2941_s22 = sadd.s32 4294967295, %s3485_s21   ;;  %p2945_p0 = scmp.ge.s32.totalorder %s3485_s21, 1  ;;  %s3485_s21 = sphi %s3524_s21, %s16_s21  }
   0x2   : > { %p213_p1 = scmp.lt.s32.totalorder %s3485_s21, 3 }
   0x4   : > { %p214_p2 = pnand %p2945_p0, %p213_p1 }
   0x5   : > { %s2946_s13 = sshll.u32 (!%p214_p2), %s2941_s22, 1 }
   0x6   : > { %217 = sbr.rel (%p214_p2) target bundleno = 1534 (0x5fe), region = 44  ;;  %p245_p3 = scmp.lt.s32.totalorder (!%p214_p2), %s2946_s13, 3 }
   0xb   : > { %v3190_v0 = vld [vmem:[%s4339_s1 + $0x4d4] ss:$88 sps:$4 sm:$0xff]   ;;  %v3192_v1 = vld [vmem:[%s4339_s1 + $0x4d0] ss:$88 sps:$4 sm:$0xff]   ;;  %v3487_v2 = vmov 0   ;;  %s4346_s13 = smov (!%p245_p3, %s2946_s13), 3 }
   0xc   : > { %1470 = vmatprep.mubr.bf16.mxu0 %v3487_v2  ;;  %1513 = vmatprep.mubr.bf16.mxu1 %v3487_v2  ;;  %v3193_v3 = vld [vmem:[%s4339_s1 + $0x424] ss:$88 sps:$4 sm:$0xff]   ;;  %v3195_v4 = vld [vmem:[%s4339_s1 + $0x420] ss:$88 sps:$4 sm:$0xff]   ;;  %v3199_v7 = vld [vmem:[%s4339_s1 + $0x374] ss:$88 sps:$4 sm:$0xff]  }
   0xd   : > { %1438 = vmatprep.subr.bf16.mxu0 %v3190_v0  ;;  %v3196_v5 = vld [vmem:[%s4339_s1 + $0x4dc] ss:$88 sps:$4 sm:$0xff]   ;;  %v3198_v6 = vld [vmem:[%s4339_s1 + $0x4d8] ss:$88 sps:$4 sm:$0xff]   ;;  %v3202_v8 = vld [vmem:[%s4339_s1 + $0x42c] ss:$88 sps:$4 sm:$0xff]  }
   0xe   : > { %1439 = vmatpush1.bf16.msra.mxu0 %v3192_v1  ;;  %1481 = vmatprep.subr.bf16.mxu1 %v3196_v5  ;;  %v3204_v9 = vld [vmem:[%s4339_s1 + $0x428] ss:$88 sps:$4 sm:$0xff]   ;;  %v3205_v11 = vld [vmem:[%s4339_s1 + $0x2c4] ss:$88 sps:$4 sm:$0xff]   ;;  %v3210_v13 = vld [vmem:[%s4339_s1 + $0x378] ss:$88 sps:$4 sm:$0xff]  }
   0xf   : > { %1440 = vmatprep.subr.bf16.mxu0 %v3193_v3  ;;  %1482 = vmatpush1.bf16.msra.mxu1 %v3198_v6  ;;  %v3201_v10 = vld [vmem:[%s4339_s1 + $0x370] ss:$88 sps:$4 sm:$0xff]   ;;  %v3208_v12 = vld [vmem:[%s4339_s1 + $0x37c] ss:$88 sps:$4 sm:$0xff]   ;;  %v3207_v14 = vld [vmem:[%s4339_s1 + $0x2c0] ss:$88 sps:$4 sm:$0xff]  }
  0x10   : > { %1483 = vmatprep.subr.bf16.mxu1 %v3202_v8  ;;  %v3214_v15 = vld [vmem:[%s4339_s1 + $0x2cc] ss:$88 sps:$4 sm:$0xff]   ;;  %v3216_v17 = vld [vmem:[%s4339_s1 + $0x2c8] ss:$88 sps:$4 sm:$0xff]   ;;  %v3220_v19 = vld [vmem:[%s4339_s1 + $0x21c] ss:$88 sps:$4 sm:$0xff]  }
  0x11   : > { %v3211_v16 = vld [vmem:[%s4339_s1 + $0x214] ss:$88 sps:$4 sm:$0xff]   ;;  %v3213_v18 = vld [vmem:[%s4339_s1 + $0x210] ss:$88 sps:$4 sm:$0xff]   ;;  %v3217_v20 = vld [vmem:[%s4339_s1 + $0x164] ss:$88 sps:$4 sm:$0xff]  }
  0x12   : > { %1441 = vmatpush1.bf16.msra.mxu0 %v3195_v4  ;;  %s2947_s18 = sshll.u32 %s4346_s13, 2  ;;  %v3222_v21 = vld [vmem:[%s4339_s1 + $0x218] ss:$88 sps:$4 sm:$0xff]   ;;  %v3226_v23 = vld [vmem:[%s4339_s1 + $0x16c] ss:$88 sps:$4 sm:$0xff]   ;;  %vm2038_vm0 = vcmask 130048  }
  0x13   : > { %1442 = vmatprep.subr.bf16.mxu0 %v3199_v7  ;;  %1484 = vmatpush1.bf16.msra.mxu1 %v3204_v9  ;;  %v3219_v22 = vld [vmem:[%s4339_s1 + $0x160] ss:$88 sps:$4 sm:$0xff]   ;;  %s248_s28 = scalar_lea.vmem %s4338_s0, %s2947_s18  ;;  %v3223_v24 = vld [vmem:[%s4339_s1 + $0xb4] ss:$88 sps:$4 sm:$0xff]   ;;  %v3225_v26 = vld [vmem:[%s4339_s1 + $0xb0] ss:$88 sps:$4 sm:$0xff]  }
  0x14   : > { %1485 = vmatprep.subr.bf16.mxu1 %v3208_v12  ;;  %v3228_v25 = vld [vmem:[%s4339_s1 + $0x168] ss:$88 sps:$4 sm:$0xff]   ;;  %v3232_v27 = vld [vmem:[%s4339_s1 + $0xbc] ss:$88 sps:$4 sm:$0xff]   ;;  %v3234_v29 = vld [vmem:[%s4339_s1 + $0xb8] ss:$88 sps:$4 sm:$0xff]  }
  0x15   : > { %v3229_v28 = vld [vmem:[%s4339_s1 + $0x4] ss:$88 sps:$4 sm:$0xff]   ;;  %v3231_v30 = vld [vmem:[%s4339_s1] ss:$88 sps:$4 sm:$0xff]   ;;  %v3244_v36 = vld [vmem:[%s4339_s1 + $0x434] ss:$88 sps:$4 sm:$0xff]  }
  0x16   : > { %1443 = vmatpush1.bf16.msra.mxu0 %v3201_v10  ;;  %v3239_v31 = vld [vmem:[%s4339_s1 + $0xc] ss:$88 sps:$4 sm:$0xff]   ;;  %v3241_v34 = vld [vmem:[%s4339_s1 + $0x8] ss:$88 sps:$4 sm:$0xff]   ;;  %v3268_v40 = vld [vmem:[%s4339_s1 + $0x43c] ss:$88 sps:$4 sm:$0xff]  }
  0x17   : > { %1444 = vmatprep.subr.bf16.mxu0 %v3205_v11  ;;  %1486 = vmatpush1.bf16.msra.mxu1 %v3210_v13  ;;  %v3238_v32 = vld [vmem:[%s4339_s1 + $0x4e4] ss:$88 sps:$4 sm:$0xff]   ;;  %v3236_v35 = vld [vmem:[%s4339_s1 + $0x4e0] ss:$88 sps:$4 sm:$0xff]   ;;  %v3242_v39 = vld [vmem:[%s4339_s1 + $0x430] ss:$88 sps:$4 sm:$0xff]  }
  0x18   : > { %1487 = vmatprep.subr.bf16.mxu1 %v3214_v15  ;;  %v3636_v33 = vld [vmem:[%s248_s28] sm:$0xff]   ;;  %v3266_v42 = vld [vmem:[%s4339_s1 + $0x438] ss:$88 sps:$4 sm:$0xff]   ;;  %v3250_v45 = vld [vmem:[%s4339_s1 + $0x2d4] ss:$88 sps:$4 sm:$0xff]   ;;  %s3146_s27 = sshll.u32 %s4346_s13, 5 }
  0x19   : > { %v3263_v37 = vld [vmem:[%s4339_s1 + $0x4e8] ss:$88 sps:$4 sm:$0xff]   ;;  %v3265_v38 = vld [vmem:[%s4339_s1 + $0x4ec] ss:$88 sps:$4 sm:$0xff]   ;;  %v3274_v48 = vld [vmem:[%s4339_s1 + $0x2dc] ss:$88 sps:$4 sm:$0xff]   ;;  %s4322_s13 = scalar_lea.vmem %s4344_s6, %s3146_s27 }
  0x1a   : > { %1445 = vmatpush1.bf16.msra.mxu0 %v3207_v14  ;;  %v3247_v41 = vld [vmem:[%s4339_s1 + $0x384] ss:$88 sps:$4 sm:$0xff]   ;;  %v3245_v43 = vld [vmem:[%s4339_s1 + $0x380] ss:$88 sps:$4 sm:$0xff]   ;;  %v3248_v47 = vld [vmem:[%s4339_s1 + $0x2d0] ss:$88 sps:$4 sm:$0xff]  }
  0x1b   : > { %1446 = vmatprep.subr.bf16.mxu0 %v3211_v16  ;;  %1488 = vmatpush1.bf16.msra.mxu1 %v3216_v17  ;;  %v3271_v44 = vld [vmem:[%s4339_s1 + $0x38c] ss:$88 sps:$4 sm:$0xff]   ;;  %v3269_v46 = vld [vmem:[%s4339_s1 + $0x388] ss:$88 sps:$4 sm:$0xff]   ;;  %v3272_v50 = vld [vmem:[%s4339_s1 + $0x2d8] ss:$88 sps:$4 sm:$0xff]  }
  0x1c   : > { %1489 = vmatprep.subr.bf16.mxu1 %v3220_v19  ;;  %v3253_v49 = vld [vmem:[%s4339_s1 + $0x224] ss:$88 sps:$4 sm:$0xff]   ;;  %v3251_v51 = vld [vmem:[%s4339_s1 + $0x220] ss:$88 sps:$4 sm:$0xff]   ;;  %v3256_v53 = vld [vmem:[%s4339_s1 + $0x174] ss:$88 sps:$4 sm:$0xff]  }
  0x1d   : > { %v3277_v52 = vld [vmem:[%s4339_s1 + $0x22c] ss:$88 sps:$4 sm:$0xff]   ;;  %v3275_v54 = vld [vmem:[%s4339_s1 + $0x228] ss:$88 sps:$4 sm:$0xff]   ;;  %v3280_v56 = vld [vmem:[%s4339_s1 + $0x17c] ss:$88 sps:$4 sm:$0xff]  }
  0x1e   : > { %1447 = vmatpush1.bf16.msra.mxu0 %v3213_v18  ;;  %v3254_v55 = vld [vmem:[%s4339_s1 + $0x170] ss:$88 sps:$4 sm:$0xff]   ;;  %v3259_v57 = vld [vmem:[%s4339_s1 + $0xc4] ss:$88 sps:$4 sm:$0xff]   ;;  %v3257_v59 = vld [vmem:[%s4339_s1 + $0xc0] ss:$88 sps:$4 sm:$0xff]  }
  0x1f   : > { %1448 = vmatprep.subr.bf16.mxu0 %v3217_v20  ;;  %1490 = vmatpush1.bf16.msra.mxu1 %v3222_v21  ;;  %v3278_v58 = vld [vmem:[%s4339_s1 + $0x178] ss:$88 sps:$4 sm:$0xff]   ;;  %v3283_v60 = vld [vmem:[%s4339_s1 + $0xcc] ss:$88 sps:$4 sm:$0xff]   ;;  %v3281_v62 = vld [vmem:[%s4339_s1 + $0xc8] ss:$88 sps:$4 sm:$0xff]  }
  0x20   : > { %1491 = vmatprep.subr.bf16.mxu1 %v3226_v23  ;;  %v3262_v61 = vld [vmem:[%s4339_s1 + $0x14] ss:$88 sps:$4 sm:$0xff]   ;;  %v3260_v63 = vld [vmem:[%s4339_s1 + $0x10] ss:$88 sps:$4 sm:$0xff]   ;;  %v3325_v6 = vld [vmem:[%s4339_s1 + $0x444] ss:$88 sps:$4 sm:$0xff]  }
  0x21   : > { %v3286_v0 = vld [vmem:[%s4339_s1 + $0x1c] ss:$88 sps:$4 sm:$0xff]   ;;  %v3284_v3 = vld [vmem:[%s4339_s1 + $0x18] ss:$88 sps:$4 sm:$0xff]   ;;  %v3292_v8 = vld [vmem:[%s4339_s1 + $0x44c] ss:$88 sps:$4 sm:$0xff]  }
  0x22   : > { %1449 = vmatpush1.bf16.msra.mxu0 %v3219_v22  ;;  %v3319_v1 = vld [vmem:[%s4339_s1 + $0x4f4] ss:$88 sps:$4 sm:$0xff]   ;;  %v3317_v5 = vld [vmem:[%s4339_s1 + $0x4f0] ss:$88 sps:$4 sm:$0xff]   ;;  %v3323_v9 = vld [vmem:[%s4339_s1 + $0x440] ss:$88 sps:$4 sm:$0xff]  }
  0x23   : > { %1450 = vmatprep.subr.bf16.mxu0 %v3223_v24  ;;  %1492 = vmatpush1.bf16.msra.mxu1 %v3228_v25  ;;  %v3289_v4 = vld [vmem:[%s4339_s1 + $0x4fc] ss:$88 sps:$4 sm:$0xff]   ;;  %v3287_v7 = vld [vmem:[%s4339_s1 + $0x4f8] ss:$88 sps:$4 sm:$0xff]   ;;  %v3290_v11 = vld [vmem:[%s4339_s1 + $0x448] ss:$88 sps:$4 sm:$0xff]  }
  0x24   : > { %1493 = vmatprep.subr.bf16.mxu1 %v3232_v27  ;;  %v3331_v10 = vld [vmem:[%s4339_s1 + $0x394] ss:$88 sps:$4 sm:$0xff]   ;;  %v3329_v13 = vld [vmem:[%s4339_s1 + $0x390] ss:$88 sps:$4 sm:$0xff]   ;;  %v3337_v14 = vld [vmem:[%s4339_s1 + $0x2e4] ss:$88 sps:$4 sm:$0xff]  }
  0x25   : > { %v3295_v12 = vld [vmem:[%s4339_s1 + $0x39c] ss:$88 sps:$4 sm:$0xff]   ;;  %v3293_v15 = vld [vmem:[%s4339_s1 + $0x398] ss:$88 sps:$4 sm:$0xff]   ;;  %v3298_v16 = vld [vmem:[%s4339_s1 + $0x2ec] ss:$88 sps:$4 sm:$0xff]  }
  0x26   : > { %1451 = vmatpush1.bf16.msra.mxu0 %v3225_v26  ;;  %v3335_v17 = vld [vmem:[%s4339_s1 + $0x2e0] ss:$88 sps:$4 sm:$0xff]   ;;  %v3343_v18 = vld [vmem:[%s4339_s1 + $0x234] ss:$88 sps:$4 sm:$0xff]   ;;  %v3341_v21 = vld [vmem:[%s4339_s1 + $0x230] ss:$88 sps:$4 sm:$0xff]  }
  0x27   : > { %1452 = vmatprep.subr.bf16.mxu0 %v3229_v28  ;;  %1494 = vmatpush1.bf16.msra.mxu1 %v3234_v29  ;;  %v3296_v19 = vld [vmem:[%s4339_s1 + $0x2e8] ss:$88 sps:$4 sm:$0xff]   ;;  %v3301_v20 = vld [vmem:[%s4339_s1 + $0x23c] ss:$88 sps:$4 sm:$0xff]   ;;  %v3299_v23 = vld [vmem:[%s4339_s1 + $0x238] ss:$88 sps:$4 sm:$0xff]  }
  0x28   : > { %1495 = vmatprep.subr.bf16.mxu1 %v3239_v31  ;;  %v3349_v22 = vld [vmem:[%s4339_s1 + $0x184] ss:$88 sps:$4 sm:$0xff]   ;;  %v3347_v25 = vld [vmem:[%s4339_s1 + $0x180] ss:$88 sps:$4 sm:$0xff]   ;;  %v3355_v27 = vld [vmem:[%s4339_s1 + $0xd4] ss:$88 sps:$4 sm:$0xff]  }
  0x29   : > { %v3304_v24 = vld [vmem:[%s4339_s1 + $0x18c] ss:$88 sps:$4 sm:$0xff]   ;;  %v3302_v26 = vld [vmem:[%s4339_s1 + $0x188] ss:$88 sps:$4 sm:$0xff]   ;;  %v3307_v28 = vld [vmem:[%s4339_s1 + $0xdc] ss:$88 sps:$4 sm:$0xff]  }
  0x2a   : > { %1453 = vmatpush1.bf16.msra.mxu0 %v3231_v30  ;;  %v3353_v29 = vld [vmem:[%s4339_s1 + $0xd0] ss:$88 sps:$4 sm:$0xff]   ;;  %v3361_v30 = vld [vmem:[%s4339_s1 + $0x24] ss:$88 sps:$4 sm:$0xff]  }
  0x2b   : > { %1524 = vmatprep.subr.bf16.mxu0 %v3238_v32  ;;  %1496 = vmatpush1.bf16.msra.mxu1 %v3241_v34  ;;  %v3305_v31 = vld [vmem:[%s4339_s1 + $0xd8] ss:$88 sps:$4 sm:$0xff]   ;;  %v3310_v32 = vld [vmem:[%s4339_s1 + $0x2c] ss:$88 sps:$4 sm:$0xff]  }
  0x2c   : > { %1567 = vmatprep.subr.bf16.mxu1 %v3265_v38  ;;  %v3359_v34 = vld [vmem:[%s4339_s1 + $0x20] ss:$88 sps:$4 sm:$0xff]   ;;  %v3316_v38 = vld [vmem:[%s4339_s1 + $0x45c] ss:$88 sps:$4 sm:$0xff]  }
  0x2d   : > { %1471 = vmatmul.mubr.bf16.vlgmr.msra.gmra.mxu0 %v3636_v33 }
  0x2e   : > { %1525 = vmatpush1.bf16.msra.mxu0 %v3236_v35  ;;  %1556 = vmatprep.mubr.bf16.mxu0 %v3487_v2  ;;  %v3308_v35 = vld [vmem:[%s4339_s1 + $0x28] ss:$88 sps:$4 sm:$0xff]  }
  0x2f   : > { %1526 = vmatprep.subr.bf16.mxu0 %v3244_v36  ;;  %1514 = vmatmul.mubr.bf16.vlgmr.msra.gmra.mxu1 %v3636_v33  ;;  %v3313_v36 = vld [vmem:[%s4339_s1 + $0x50c] ss:$88 sps:$4 sm:$0xff]  }
  0x30   : > { %1568 = vmatpush1.bf16.msra.mxu1 %v3263_v37  ;;  %1599 = vmatprep.mubr.bf16.mxu1 %v3487_v2  ;;  %v3311_v37 = vld [vmem:[%s4339_s1 + $0x508] ss:$88 sps:$4 sm:$0xff]  }
  0x31   : > { %1569 = vmatprep.subr.bf16.mxu1 %v3268_v40  ;;  %v3322_v40 = vld [vmem:[%s4339_s1 + $0x3ac] ss:$88 sps:$4 sm:$0xff]  }
  0x32   : > { %1527 = vmatpush1.bf16.msra.mxu0 %v3242_v39  ;;  %v3314_v39 = vld [vmem:[%s4339_s1 + $0x458] ss:$88 sps:$4 sm:$0xff]  }
  0x33   : > { %1528 = vmatprep.subr.bf16.mxu0 %v3247_v41  ;;  %v3320_v41 = vld [vmem:[%s4339_s1 + $0x3a8] ss:$88 sps:$4 sm:$0xff]  }
  0x34   : > { %1570 = vmatpush1.bf16.msra.mxu1 %v3266_v42  ;;  %v3328_v42 = vld [vmem:[%s4339_s1 + $0x2fc] ss:$88 sps:$4 sm:$0xff]  }
  0x35   : > { %1571 = vmatprep.subr.bf16.mxu1 %v3271_v44  ;;  %v3334_v44 = vld [vmem:[%s4339_s1 + $0x24c] ss:$88 sps:$4 sm:$0xff]  }
  0x36   : > { %1529 = vmatpush1.bf16.msra.mxu0 %v3245_v43  ;;  %v3326_v43 = vld [vmem:[%s4339_s1 + $0x2f8] ss:$88 sps:$4 sm:$0xff]  }
  0x37   : > { %1530 = vmatprep.subr.bf16.mxu0 %v3250_v45  ;;  %v3332_v45 = vld [vmem:[%s4339_s1 + $0x248] ss:$88 sps:$4 sm:$0xff]  }
  0x38   : > { %1572 = vmatpush1.bf16.msra.mxu1 %v3269_v46  ;;  %v3340_v46 = vld [vmem:[%s4339_s1 + $0x19c] ss:$88 sps:$4 sm:$0xff]  }
  0x39   : > { %1573 = vmatprep.subr.bf16.mxu1 %v3274_v48  ;;  %v3346_v48 = vld [vmem:[%s4339_s1 + $0xec] ss:$88 sps:$4 sm:$0xff]  }
  0x3a   : > { %1531 = vmatpush1.bf16.msra.mxu0 %v3248_v47  ;;  %v3338_v47 = vld [vmem:[%s4339_s1 + $0x198] ss:$88 sps:$4 sm:$0xff]  }
  0x3b   : > { %1532 = vmatprep.subr.bf16.mxu0 %v3253_v49  ;;  %v3344_v49 = vld [vmem:[%s4339_s1 + $0xe8] ss:$88 sps:$4 sm:$0xff]  }
  0x3c   : > { %1574 = vmatpush1.bf16.msra.mxu1 %v3272_v50  ;;  %v3352_v50 = vld [vmem:[%s4339_s1 + $0x3c] ss:$88 sps:$4 sm:$0xff]  }
  0x3d   : > { %1575 = vmatprep.subr.bf16.mxu1 %v3277_v52  ;;  %v3358_v52 = vld [vmem:[%s4339_s1 + $0x51c] ss:$88 sps:$4 sm:$0xff]  }
  0x3e   : > { %1533 = vmatpush1.bf16.msra.mxu0 %v3251_v51  ;;  %v3350_v51 = vld [vmem:[%s4339_s1 + $0x38] ss:$88 sps:$4 sm:$0xff]  }
  0x3f   : > { %1534 = vmatprep.subr.bf16.mxu0 %v3256_v53  ;;  %v3356_v53 = vld [vmem:[%s4339_s1 + $0x518] ss:$88 sps:$4 sm:$0xff]  }
  0x40   : > { %1576 = vmatpush1.bf16.msra.mxu1 %v3275_v54  ;;  %v3364_v54 = vld [vmem:[%s4339_s1 + $0x46c] ss:$88 sps:$4 sm:$0xff]  }
  0x41   : > { %1577 = vmatprep.subr.bf16.mxu1 %v3280_v56  ;;  %v3367_v56 = vld [vmem:[%s4339_s1 + $0x3bc] ss:$88 sps:$4 sm:$0xff]  }
  0x42   : > { %1535 = vmatpush1.bf16.msra.mxu0 %v3254_v55  ;;  %v3362_v55 = vld [vmem:[%s4339_s1 + $0x468] ss:$88 sps:$4 sm:$0xff]  }
  0x43   : > { %1536 = vmatprep.subr.bf16.mxu0 %v3259_v57  ;;  %v442_v57 = vlaneseq }
  0x44   : > { %1578 = vmatpush1.bf16.msra.mxu1 %v3278_v58  ;;  %v3383_v58 = vld [vmem:[%s4339_s1 + $0x500] ss:$88 sps:$4 sm:$0xff]  }
  0x45   : > { %1579 = vmatprep.subr.bf16.mxu1 %v3283_v60  ;;  %v3365_v60 = vld [vmem:[%s4339_s1 + $0x3b8] ss:$88 sps:$4 sm:$0xff]  }
  0x46   : > { %1537 = vmatpush1.bf16.msra.mxu0 %v3257_v59  ;;  %v3385_v59 = vld [vmem:[%s4339_s1 + $0x504] ss:$88 sps:$4 sm:$0xff]  }
  0x47   : > { %1538 = vmatprep.subr.bf16.mxu0 %v3262_v61  ;;  %v3388_v61 = vld [vmem:[%s4339_s1 + $0x454] ss:$88 sps:$4 sm:$0xff]  }
  0x48   : > { %1580 = vmatpush1.bf16.msra.mxu1 %v3281_v62  ;;  %v3370_v62 = vld [vmem:[%s4339_s1 + $0x30c] ss:$88 sps:$4 sm:$0xff]  }
  0x49   : > { %1581 = vmatprep.subr.bf16.mxu1 %v3286_v0  ;;  %v3386_v0 = vld [vmem:[%s4339_s1 + $0x450] ss:$88 sps:$4 sm:$0xff]  }
  0x4a   : > { %1539 = vmatpush1.bf16.msra.mxu0 %v3260_v63  ;;  %v3922_v63 = vshrl.u32 %v442_v57, 7  ;;  %v3449_v57 = vld [vmem:[%s4339_s1 + $0x100] ss:$88 sps:$4 sm:$0xff]  }
  0x4b   : > { %1610 = vmatprep.subr.bf16.mxu0 %v3319_v1  ;;  %v3391_v1 = vld [vmem:[%s4339_s1 + $0x3a4] ss:$88 sps:$4 sm:$0xff]  }
  0x4c   : > { %1582 = vmatpush1.bf16.msra.mxu1 %v3284_v3  ;;  %v472_v3 = vsub.s32 7, %v3922_v63 }
  0x4d   : > { %1557 = vmatmul.mubr.bf16.vlgmr.msra.gmra.mxu0 %v3636_v33  ;;  %1653 = vmatprep.subr.bf16.mxu1 %v3289_v4  ;;  %v3368_v4 = vld [vmem:[%s4339_s1 + $0x308] ss:$88 sps:$4 sm:$0xff]  }
  0x4e   : > { %1611 = vmatpush1.bf16.msra.mxu0 %v3317_v5  ;;  %1642 = vmatprep.mubr.bf16.mxu0 %v3487_v2  ;;  %v3937_v5 = vld [vmem:[%s4340_s2] sm:$0xff] }
  0x4f   : > { %1612 = vmatprep.subr.bf16.mxu0 %v3325_v6  ;;  %1600 = vmatmul.mubr.bf16.vlgmr.msra.gmra.mxu1 %v3636_v33  ;;  %v3373_v6 = vld [vmem:[%s4339_s1 + $0x25c] ss:$88 sps:$4 sm:$0xff]  }
  0x50   : > { %1654 = vmatpush1.bf16.msra.mxu1 %v3287_v7  ;;  %1685 = vmatprep.mubr.bf16.mxu1 %v3487_v2  ;;  %v3945_v7 = vrot.slane %v3937_v5, %v472_v3 }
  0x51   : > { %1655 = vmatprep.subr.bf16.mxu1 %v3292_v8  ;;  %v3389_v8 = vld [vmem:[%s4339_s1 + $0x3a0] ss:$88 sps:$4 sm:$0xff]  }
  0x52   : > { %1613 = vmatpush1.bf16.msra.mxu0 %v3323_v9  ;;  %v3394_v9 = vld [vmem:[%s4339_s1 + $0x2f4] ss:$88 sps:$4 sm:$0xff]  }
  0x53   : > { %1614 = vmatprep.subr.bf16.mxu0 %v3331_v10  ;;  %v3371_v10 = vld [vmem:[%s4339_s1 + $0x258] ss:$88 sps:$4 sm:$0xff]  }
  0x54   : > { %1656 = vmatpush1.bf16.msra.mxu1 %v3290_v11  ;;  %v3376_v11 = vld [vmem:[%s4339_s1 + $0x1ac] ss:$88 sps:$4 sm:$0xff]  }
  0x55   : > { %1657 = vmatprep.subr.bf16.mxu1 %v3295_v12  ;;  %v3392_v12 = vld [vmem:[%s4339_s1 + $0x2f0] ss:$88 sps:$4 sm:$0xff]  }
  0x56   : > { %1615 = vmatpush1.bf16.msra.mxu0 %v3329_v13  ;;  %v3397_v13 = vld [vmem:[%s4339_s1 + $0x244] ss:$88 sps:$4 sm:$0xff]  }
  0x57   : > { %1616 = vmatprep.subr.bf16.mxu0 %v3337_v14  ;;  %v3374_v14 = vld [vmem:[%s4339_s1 + $0x1a8] ss:$88 sps:$4 sm:$0xff]  }
  0x58   : > { %1658 = vmatpush1.bf16.msra.mxu1 %v3293_v15  ;;  %v3379_v15 = vld [vmem:[%s4339_s1 + $0xfc] ss:$88 sps:$4 sm:$0xff]  }
  0x59   : > { %1659 = vmatprep.subr.bf16.mxu1 %v3298_v16  ;;  %v3395_v16 = vld [vmem:[%s4339_s1 + $0x240] ss:$88 sps:$4 sm:$0xff]  }
  0x5a   : > { %1617 = vmatpush1.bf16.msra.mxu0 %v3335_v17  ;;  %v3400_v17 = vld [vmem:[%s4339_s1 + $0x194] ss:$88 sps:$4 sm:$0xff]  }
  0x5b   : > { %1618 = vmatprep.subr.bf16.mxu0 %v3343_v18  ;;  %v3377_v18 = vld [vmem:[%s4339_s1 + $0xf8] ss:$88 sps:$4 sm:$0xff]  }
  0x5c   : > { %1660 = vmatpush1.bf16.msra.mxu1 %v3296_v19  ;;  %v3382_v19 = vld [vmem:[%s4339_s1 + $0x4c] ss:$88 sps:$4 sm:$0xff]  }
  0x5d   : > { %1661 = vmatprep.subr.bf16.mxu1 %v3301_v20  ;;  %v3398_v20 = vld [vmem:[%s4339_s1 + $0x190] ss:$88 sps:$4 sm:$0xff]  }
  0x5e   : > { %1619 = vmatpush1.bf16.msra.mxu0 %v3341_v21  ;;  %v3403_v21 = vld [vmem:[%s4339_s1 + $0xe4] ss:$88 sps:$4 sm:$0xff]  }
  0x5f   : > { %1620 = vmatprep.subr.bf16.mxu0 %v3349_v22  ;;  %v3380_v22 = vld [vmem:[%s4339_s1 + $0x48] ss:$88 sps:$4 sm:$0xff]  }
  0x60   : > { %1662 = vmatpush1.bf16.msra.mxu1 %v3299_v23  ;;  %v3401_v23 = vld [vmem:[%s4339_s1 + $0xe0] ss:$88 sps:$4 sm:$0xff]  }
  0x61   : > { %1663 = vmatprep.subr.bf16.mxu1 %v3304_v24  ;;  %v3406_v24 = vld [vmem:[%s4339_s1 + $0x34] ss:$88 sps:$4 sm:$0xff]  }
  0x62   : > { %1621 = vmatpush1.bf16.msra.mxu0 %v3347_v25  ;;  %v3404_v25 = vld [vmem:[%s4339_s1 + $0x30] ss:$88 sps:$4 sm:$0xff]  }
  0x63   : > { %1622 = vmatprep.subr.bf16.mxu0 %v3355_v27  ;;  %v3407_v27 = vld [vmem:[%s4339_s1 + $0x510] ss:$88 sps:$4 sm:$0xff]  }
  0x64   : > { %1664 = vmatpush1.bf16.msra.mxu1 %v3302_v26  ;;  %v3409_v26 = vld [vmem:[%s4339_s1 + $0x514] ss:$88 sps:$4 sm:$0xff]  }
  0x65   : > { %1665 = vmatprep.subr.bf16.mxu1 %v3307_v28  ;;  %v3412_v28 = vld [vmem:[%s4339_s1 + $0x464] ss:$88 sps:$4 sm:$0xff]  }
  0x66   : > { %1623 = vmatpush1.bf16.msra.mxu0 %v3353_v29  ;;  %v3410_v29 = vld [vmem:[%s4339_s1 + $0x460] ss:$88 sps:$4 sm:$0xff]  }
  0x67   : > { %1624 = vmatprep.subr.bf16.mxu0 %v3361_v30  ;;  %v3415_v30 = vld [vmem:[%s4339_s1 + $0x3b4] ss:$88 sps:$4 sm:$0xff]  }
  0x68   : > { %1666 = vmatpush1.bf16.msra.mxu1 %v3305_v31  ;;  %v3413_v31 = vld [vmem:[%s4339_s1 + $0x3b0] ss:$88 sps:$4 sm:$0xff]  }
  0x69   : > { %1667 = vmatprep.subr.bf16.mxu1 %v3310_v32  ;;  %v3418_v32 = vld [vmem:[%s4339_s1 + $0x304] ss:$88 sps:$4 sm:$0xff]  }
  0x6a   : > { %1625 = vmatpush1.bf16.msra.mxu0 %v3359_v34  ;;  %v3416_v34 = vld [vmem:[%s4339_s1 + $0x300] ss:$88 sps:$4 sm:$0xff]  }
  0x6b   : > { %1696 = vmatprep.subr.bf16.mxu0 %v3385_v59  ;;  %v3454_v59 = vld [vmem:[%s4339_s1 + $0x54] ss:$88 sps:$4 sm:$0xff]  }
  0x6c   : > { %1668 = vmatpush1.bf16.msra.mxu1 %v3308_v35  ;;  %v3421_v35 = vld [vmem:[%s4339_s1 + $0x254] ss:$88 sps:$4 sm:$0xff]  }
  0x6d   : > { %1643 = vmatmul.mubr.bf16.vlgmr.msra.gmra.mxu0 %v3636_v33  ;;  %1739 = vmatprep.subr.bf16.mxu1 %v3313_v36  ;;  %v3419_v36 = vld [vmem:[%s4339_s1 + $0x250] ss:$88 sps:$4 sm:$0xff]  }
  0x6e   : > { %1728 = vmatprep.mubr.bf16.mxu0 %v3487_v2  ;;  %1697 = vmatpush1.bf16.msra.mxu0 %v3383_v58  ;;  %v4103_v58 = vsub.s32 0, %v3922_v63 }
  0x6f   : > { %1686 = vmatmul.mubr.bf16.vlgmr.msra.gmra.mxu1 %v3636_v33  ;;  %1698 = vmatprep.subr.bf16.mxu0 %v3388_v61 }
  0x70   : > { %1740 = vmatpush1.bf16.msra.mxu1 %v3311_v37  ;;  %1771 = vmatprep.mubr.bf16.mxu1 %v3487_v2  ;;  %v3424_v37 = vld [vmem:[%s4339_s1 + $0x1a4] ss:$88 sps:$4 sm:$0xff]  }
  0x71   : > { %1741 = vmatprep.subr.bf16.mxu1 %v3316_v38  ;;  %v3422_v38 = vld [vmem:[%s4339_s1 + $0x1a0] ss:$88 sps:$4 sm:$0xff]  }
  0x72   : > { %1699 = vmatpush1.bf16.msra.mxu0 %v3386_v0 }
  0x73   : > { %1700 = vmatprep.subr.bf16.mxu0 %v3391_v1  ;;  %v3452_v1 = vld [vmem:[%s4339_s1 + $0x50] ss:$88 sps:$4 sm:$0xff]  }
  0x74   : > { %1742 = vmatpush1.bf16.msra.mxu1 %v3314_v39  ;;  %v3427_v39 = vld [vmem:[%s4339_s1 + $0xf4] ss:$88 sps:$4 sm:$0xff]  }
  0x75   : > { %1743 = vmatprep.subr.bf16.mxu1 %v3322_v40  ;;  %v3425_v40 = vld [vmem:[%s4339_s1 + $0xf0] ss:$88 sps:$4 sm:$0xff]  }
  0x76   : > { %1701 = vmatpush1.bf16.msra.mxu0 %v3389_v8 }
  0x77   : > { %1702 = vmatprep.subr.bf16.mxu0 %v3394_v9 }
  0x78   : > { %1744 = vmatpush1.bf16.msra.mxu1 %v3320_v41  ;;  %v3430_v41 = vld [vmem:[%s4339_s1 + $0x44] ss:$88 sps:$4 sm:$0xff]  }
  0x79   : > { %1745 = vmatprep.subr.bf16.mxu1 %v3328_v42  ;;  %v3428_v42 = vld [vmem:[%s4339_s1 + $0x40] ss:$88 sps:$4 sm:$0xff]  }
  0x7a   : > { %1703 = vmatpush1.bf16.msra.mxu0 %v3392_v12 }
  0x7b   : > { %1704 = vmatprep.subr.bf16.mxu0 %v3397_v13 }
  0x7c   : > { %1746 = vmatpush1.bf16.msra.mxu1 %v3326_v43  ;;  %v3433_v43 = vld [vmem:[%s4339_s1 + $0x524] ss:$88 sps:$4 sm:$0xff]  }
  0x7d   : > { %1747 = vmatprep.subr.bf16.mxu1 %v3334_v44  ;;  %v3431_v44 = vld [vmem:[%s4339_s1 + $0x520] ss:$88 sps:$4 sm:$0xff]  }
  0x7e   : > { %1705 = vmatpush1.bf16.msra.mxu0 %v3395_v16 }
  0x7f   : > { %1706 = vmatprep.subr.bf16.mxu0 %v3400_v17 }
  0x80   : > { %1748 = vmatpush1.bf16.msra.mxu1 %v3332_v45  ;;  %v3436_v45 = vld [vmem:[%s4339_s1 + $0x474] ss:$88 sps:$4 sm:$0xff]  }
  0x81   : > { %1749 = vmatprep.subr.bf16.mxu1 %v3340_v46  ;;  %v3434_v46 = vld [vmem:[%s4339_s1 + $0x470] ss:$88 sps:$4 sm:$0xff]  }
  0x82   : > { %1707 = vmatpush1.bf16.msra.mxu0 %v3398_v20 }
  0x83   : > { %1708 = vmatprep.subr.bf16.mxu0 %v3403_v21 }
  0x84   : > { %1750 = vmatpush1.bf16.msra.mxu1 %v3338_v47  ;;  %v3439_v47 = vld [vmem:[%s4339_s1 + $0x3c4] ss:$88 sps:$4 sm:$0xff]  }
  0x85   : > { %1751 = vmatprep.subr.bf16.mxu1 %v3346_v48  ;;  %v3437_v48 = vld [vmem:[%s4339_s1 + $0x3c0] ss:$88 sps:$4 sm:$0xff]  }
  0x86   : > { %1709 = vmatpush1.bf16.msra.mxu0 %v3401_v23  ;;  %v4128_v23 = vsub.s32 4, %v3922_v63 }
  0x87   : > { %1710 = vmatprep.subr.bf16.mxu0 %v3406_v24  ;;  %v4131_v24 = vsub.s32 5, %v3922_v63 }
  0x88   : > { %1752 = vmatpush1.bf16.msra.mxu1 %v3344_v49  ;;  %v3442_v49 = vld [vmem:[%s4339_s1 + $0x314] ss:$88 sps:$4 sm:$0xff]  }
  0x89   : > { %1753 = vmatprep.subr.bf16.mxu1 %v3352_v50  ;;  %v3445_v50 = vld [vmem:[%s4339_s1 + $0x264] ss:$88 sps:$4 sm:$0xff]  }
  0x8a   : > { %1711 = vmatpush1.bf16.msra.mxu0 %v3404_v25  ;;  %v468_v25 = vsub.s32 6, %v3922_v63 }
  0x8b   : > { %1782 = vmatprep.subr.bf16.mxu0 %v3409_v26  ;;  %v465_v26 = vrot.slane %v3937_v5, %v4131_v24 }
  0x8c   : > { %1754 = vmatpush1.bf16.msra.mxu1 %v3350_v51  ;;  %v3443_v51 = vld [vmem:[%s4339_s1 + $0x260] ss:$88 sps:$4 sm:$0xff]  }
  0x8d   : > { %1825 = vmatprep.subr.bf16.mxu1 %v3358_v52  ;;  %1729 = vmatmul.mubr.bf16.vlgmr.msra.gmra.mxu0 %v3636_v33  ;;  %v3448_v52 = vld [vmem:[%s4339_s1 + $0x1b4] ss:$88 sps:$4 sm:$0xff]  }
  0x8e   : > { %1783 = vmatpush1.bf16.msra.mxu0 %v3407_v27  ;;  %1814 = vmatprep.mubr.bf16.mxu0 %v3487_v2 }
  0x8f   : > { %1772 = vmatmul.mubr.bf16.vlgmr.msra.gmra.mxu1 %v3636_v33  ;;  %1784 = vmatprep.subr.bf16.mxu0 %v3412_v28  ;;  %v469_v28 = vrot.slane %v3937_v5, %v468_v25 }
  0x90   : > { %1826 = vmatpush1.bf16.msra.mxu1 %v3356_v53  ;;  %1857 = vmatprep.mubr.bf16.mxu1 %v3487_v2  ;;  %v3446_v53 = vld [vmem:[%s4339_s1 + $0x1b0] ss:$88 sps:$4 sm:$0xff]  }
  0x91   : > { %1827 = vmatprep.subr.bf16.mxu1 %v3364_v54  ;;  %v3451_v54 = vld [vmem:[%s4339_s1 + $0x104] ss:$88 sps:$4 sm:$0xff]  }
  0x92   : > { %1785 = vmatpush1.bf16.msra.mxu0 %v3410_v29 }
  0x93   : > { %1786 = vmatprep.subr.bf16.mxu0 %v3415_v30 }
  0x94   : > { %1828 = vmatpush1.bf16.msra.mxu1 %v3362_v55  ;;  %v4094_v55 = vsub.s32 2, %v3922_v63 }
  0x95   : > { %1829 = vmatprep.subr.bf16.mxu1 %v3367_v56  ;;  %v4097_v56 = vsub.s32 3, %v3922_v63 }
  0x96   : > { %1787 = vmatpush1.bf16.msra.mxu0 %v3413_v31  ;;  %v453_v61 = vrot.slane %v3937_v5, %v4094_v55 }
  0x97   : > { %1788 = vmatprep.subr.bf16.mxu0 %v3418_v32  ;;  %v457_v0 = vrot.slane %v3937_v5, %v4097_v56 }
  0x98   : > { %1830 = vmatpush1.bf16.msra.mxu1 %v3365_v60 }
  0x99   : > { %1831 = vmatprep.subr.bf16.mxu1 %v3370_v62 }
  0x9a   : > { %1789 = vmatpush1.bf16.msra.mxu0 %v3416_v34 }
  0x9b   : > { %1790 = vmatprep.subr.bf16.mxu0 %v3421_v35 }
  0x9c   : > { %1832 = vmatpush1.bf16.msra.mxu1 %v3368_v4  ;;  %v445_v4 = vrot.slane %v3937_v5, %v4103_v58 }
  0x9d   : > { %1833 = vmatprep.subr.bf16.mxu1 %v3373_v6 }
  0x9e   : > { %1791 = vmatpush1.bf16.msra.mxu0 %v3419_v36 }
  0x9f   : > { %1792 = vmatprep.subr.bf16.mxu0 %v3424_v37 }
  0xa0   : > { %1834 = vmatpush1.bf16.msra.mxu1 %v3371_v10  ;;  %v4120_v10 = vsub.s32 1, %v3922_v63 }
  0xa1   : > { %1835 = vmatprep.subr.bf16.mxu1 %v3376_v11 }
  0xa2   : > { %1793 = vmatpush1.bf16.msra.mxu0 %v3422_v38 }
  0xa3   : > { %1794 = vmatprep.subr.bf16.mxu0 %v3427_v39 }
  0xa4   : > { %1836 = vmatpush1.bf16.msra.mxu1 %v3374_v14 }
  0xa5   : > { %1837 = vmatprep.subr.bf16.mxu1 %v3379_v15 }
  0xa6   : > { %1795 = vmatpush1.bf16.msra.mxu0 %v3425_v40 }
  0xa7   : > { %1796 = vmatprep.subr.bf16.mxu0 %v3430_v41 }
  0xa8   : > { %1838 = vmatpush1.bf16.msra.mxu1 %v3377_v18  ;;  %v449_v18 = vrot.slane %v3937_v5, %v4120_v10 }
  0xa9   : > { %1839 = vmatprep.subr.bf16.mxu1 %v3382_v19 }
  0xaa   : > { %1797 = vmatpush1.bf16.msra.mxu0 %v3428_v42 }
  0xab   : > { %1868 = vmatprep.subr.bf16.mxu0 %v3433_v43 }
  0xac   : > { %1840 = vmatpush1.bf16.msra.mxu1 %v3380_v22 }
  0xad   : > { %1815 = vmatmul.mubr.bf16.vlgmr.msra.gmra.mxu0 %v3636_v33 }
  0xae   : > { %1869 = vmatpush1.bf16.msra.mxu0 %v3431_v44  ;;  %1900 = vmatprep.mubr.bf16.mxu0 %v3487_v2  ;;  %v3440_v2 = vld [vmem:[%s4339_s1 + $0x310] ss:$88 sps:$4 sm:$0xff]  }
  0xaf   : > { %1858 = vmatmul.mubr.bf16.vlgmr.msra.gmra.mxu1 %v3636_v33  ;;  %1870 = vmatprep.subr.bf16.mxu0 %v3436_v45  ;;  %v4158_v45 = vld [vmem:[%s4340_s2 + $0x8] sm:$0xff] }
  0xb2   : > { %1871 = vmatpush1.bf16.msra.mxu0 %v3434_v46  ;;  %v477_v46 = vrot.slane %v4158_v45, %v4103_v58 }
  0xb3   : > { %1872 = vmatprep.subr.bf16.mxu0 %v3439_v47 }
  0xb6   : > { %1873 = vmatpush1.bf16.msra.mxu0 %v3437_v48 }
  0xb7   : > { %1874 = vmatprep.subr.bf16.mxu0 %v3442_v49  ;;  %v481_v49 = vrot.slane %v4158_v45, %v4120_v10 }
  0xba   : > { %1875 = vmatpush1.bf16.msra.mxu0 %v3440_v2 }
  0xbb   : > { %1876 = vmatprep.subr.bf16.mxu0 %v3445_v50  ;;  %v485_v50 = vrot.slane %v4158_v45, %v4094_v55 }
  0xbe   : > { %1877 = vmatpush1.bf16.msra.mxu0 %v3443_v51  ;;  %v489_v51 = vrot.slane %v4158_v45, %v4097_v56 }
  0xbf   : > { %1878 = vmatprep.subr.bf16.mxu0 %v3448_v52 }
  0xc2   : > { %1879 = vmatpush1.bf16.msra.mxu0 %v3446_v53 }
  0xc3   : > { %1880 = vmatprep.subr.bf16.mxu0 %v3451_v54 }
  0xc6   : > { %1881 = vmatpush1.bf16.msra.mxu0 %v3449_v57 }
  0xc7   : > { %1882 = vmatprep.subr.bf16.mxu0 %v3454_v59 }
  0xca   : > { %1883 = vmatpush1.bf16.msra.mxu0 %v3452_v1 }
  0xcd   : > { %1901 = vmatmul.mubr.bf16.vlgmr.msra.gmra.mxu0 %v3636_v33  ;;  %v461_v33 = vrot.slane %v3937_v5, %v4128_v23 }
  0xed   : > { %v1472_v60 = vpop.f32.mrf.mxu0 }
  0xee   : > { %v1473_v14 = vadd.f32 %v1472_v60, %v445_v4 }
  0xef   : > { %v1474_v62 = vpop.f32.mrf.mxu0  ;;  %v1515_v6 = vpop.f32.mrf.mxu1 }
  0xf0   : > { %v4117_v9 = vadd.f32 %v1515_v6, %v453_v61  ;;  %v1475_v22 = vadd.f32 %v1474_v62, %v449_v18  ;;  %v505_v6 = vrot.slane %v4158_v45, %v472_v3 }
  0xf1   : > { %v1476_v8 = vpop.f32.mrf.mxu0  ;;  %v1517_v12 = vpop.f32.mrf.mxu1 }
  0xf2   : > { %v1477_v11 = vadd.f32 %v1476_v8, %v445_v4  ;;  %v1518_v13 = vadd.f32 %v1517_v12, %v457_v0 }
  0xf3   : > { %v1519_v15 = vpop.f32.mrf.mxu1  ;;  %v1478_v16 = vpop.f32.mrf.mxu0 }
  0xf4   : > { %3159 = vmatprep.subr.mxu1 %v1477_v11  ;;  %v4122_v17 = vadd.f32 %v1519_v15, %v453_v61  ;;  %3163 = vmatprep.mubr.f32.mxu1 %v1518_v13  ;;  %v1479_v20 = vadd.f32 %v1478_v16, %v449_v18 }
  0xf5   : > { %3160 = vmatpush3.xpose.msra.mxu1 %v1477_v11  ;;  %v1521_v19 = vpop.f32.mrf.mxu1 }
  0xf6   : > { %3161 = vmatprep.subr.mxu1 %v1473_v14  ;;  %v1522_v21 = vadd.f32 %v1521_v19, %v457_v0 }
  0xf9   : > { %3162 = vmatpush3.xpose.msra.mxu1 %v1473_v14 }
  0xfa   : > { %3166 = vmatprep.subr.mxu1 %v1479_v20 }
  0xfc   : > { %3164 = vmatmul.mubr.f32.vlgmr.msra.gmra.mxu1 %v1522_v21 }
  0xfd   : > { %3167 = vmatpush3.xpose.msra.mxu1 %v1479_v20 }
  0xfe   : > { %3168 = vmatprep.subr.mxu1 %v1475_v22 }
 0x101   : > { %3169 = vmatpush3.xpose.msra.mxu1 %v1475_v22 }
 0x10d   : > { %v1558_v27 = vpop.f32.mrf.mxu0 }
 0x10e   : > { %v1559_v29 = vadd.f32 %v1558_v27, %v461_v33 }
 0x10f   : > { %v1560_v30 = vpop.f32.mrf.mxu0  ;;  %v1601_v32 = vpop.f32.mrf.mxu1 }
 0x110   : > { %v4141_v31 = vadd.f32 %v1560_v30, %v465_v26  ;;  %3170 = vmatprep.mubr.f32.mxu1 %v1559_v29  ;;  %v4143_v35 = vadd.f32 %v1601_v32, %v469_v28 }
 0x111   : > { %v1562_v34 = vpop.f32.mrf.mxu0  ;;  %v1603_v37 = vpop.f32.mrf.mxu1 }
 0x112   : > { %v1563_v36 = vadd.f32 %v1562_v34, %v461_v33  ;;  %v4146_v39 = vadd.f32 %v1603_v37, %v3945_v7 }
 0x113   : > { %v1564_v38 = vpop.f32.mrf.mxu0  ;;  %v1605_v41 = vpop.f32.mrf.mxu1 }
 0x114   : > { %v4148_v40 = vadd.f32 %v1564_v38, %v465_v26  ;;  %3171 = vmatmul.mubr.f32.vlgmr.msra.gmra.mxu1 %v1563_v36  ;;  %v4150_v5 = vadd.f32 %v1605_v41, %v469_v28 }
 0x115   : > { %v1607_v42 = vpop.f32.mrf.mxu1 }
 0x116   : > { %v4153_v43 = vadd.f32 %v1607_v42, %v3945_v7 }
 0x12d   : > { %v1644_v44 = vpop.f32.mrf.mxu0 }
 0x12e   : > { %v1645_v60 = vadd.f32 %v1644_v44, %v477_v46 }
 0x12f   : > { %v1646_v47 = vpop.f32.mrf.mxu0  ;;  %v1687_v48 = vpop.f32.mrf.mxu1 }
 0x130   : > { %v1647_v57 = vadd.f32 %v1646_v47, %v481_v49  ;;  %v1688_v4 = vadd.f32 %v1687_v48, %v485_v50 }
 0x131   : > { %v1648_v2 = vpop.f32.mrf.mxu0  ;;  %v1689_v7 = vpop.f32.mrf.mxu1 }
 0x132   : > { %v1649_v52 = vadd.f32 %v1648_v2, %v477_v46  ;;  %v1690_v0 = vadd.f32 %v1689_v7, %v489_v51 }
 0x133   : > { %v1650_v53 = vpop.f32.mrf.mxu0  ;;  %v1691_v54 = vpop.f32.mrf.mxu1 }
 0x134   : > { %v1651_v59 = vadd.f32 %v1650_v53, %v481_v49  ;;  %v1692_v61 = vadd.f32 %v1691_v54, %v485_v50 }
 0x135   : > { %v1693_v62 = vpop.f32.mrf.mxu1 }
 0x136   : > { %2460 = vmatprep.subr.mxu0 %v1651_v59  ;;  %v1694_v1 = vadd.f32 %v1693_v62, %v489_v51 }
 0x137   : > { %2461 = vmatpush1.msra.mxu0 %v1649_v52 }
 0x138   : > { %2462 = vmatprep.subr.mxu0 %v1647_v57  ;;  %2223 = vmatprep.subr.mxu1 %v1694_v1 }
 0x139   : > { %2463 = vmatpush1.msra.mxu0 %v1645_v60  ;;  %2224 = vmatpush1.msra.mxu1 %v1692_v61 }
 0x13a   : > { %2225 = vmatprep.subr.mxu1 %v1690_v0  ;;  %v497_v0 = vrot.slane %v4158_v45, %v4131_v24 }
 0x13b   : > { %2226 = vmatpush1.msra.mxu1 %v1688_v4 }
 0x14d   : > { %v1730_v62 = vpop.f32.mrf.mxu0 }
 0x14f   : > { %v4171_v8 = vpop.f32.mrf.mxu1  ;;  %v1732_v1 = vpop.f32.mrf.mxu0 }
 0x150   : > { %v1733_v4 = vadd.f32 %v1732_v1, %v497_v0 }
 0x151   : > { %v1775_v11 = vpop.f32.mrf.mxu1 }
 0x152   : > { %v4173_v12 = vadd.f32 %v1775_v11, %v505_v6 }
 0x153   : > { %v4175_v13 = vpop.f32.mrf.mxu1 }
 0x155   : > { %v1779_v14 = vpop.f32.mrf.mxu1 }
 0x156   : > { %v1780_v15 = vadd.f32 %v1779_v14, %v505_v6  ;;  %v1734_v6 = vpop.f32.mrf.mxu0  ;;  %v3488_v14 = vmov 0.0  }
 0x157   : > { %2259 = vmatprep.mubr.f32.mxu1 %v3488_v14  ;;  %2496 = vmatprep.mubr.f32.mxu0 %v3488_v14 }
 0x158   : > { %2659 = vmatprep.subr.mxu0 %v1780_v15  ;;  %v1736_v11 = vpop.f32.mrf.mxu0 }
 0x159   : > { %v1737_v15 = vadd.f32 %v1736_v11, %v497_v0 }
 0x15b   : > { %2300 = vmatprep.subr.mxu1 %v1737_v15 }
 0x16f   : > { %v4177_v16 = vpop.f32.mrf.mxu1 }
 0x171   : > { %v4179_v18 = vpop.f32.mrf.mxu1 }
 0x173   : > { %v4181_v19 = vpop.f32.mrf.mxu1 }
 0x175   : > { %v4183_v20 = vpop.f32.mrf.mxu1 }
 0x1bc   : > { %v3165_v21 = vpop.f32.mrf.mxu1 }
 0x1bd   : > { %v2037_v22 = vmul.f32 0.0078125, %v3165_v21 }
 0x1be   : > { %v2027_v3 = vpop.f32.mrf.mxu1 }
 0x1bf   : > { %v2036_v33 = vmul.f32 0.0078125, %v2027_v3  ;;  %v2042_v27 = vsel %vm2038_vm0, %v2037_v22, -inf }
 0x1c1   : > { %v2039_v26 = vsel %vm2038_vm0, %v2036_v33, -inf }
 0x1c2   : > { %2040 = vmax.xlane.f32.xlu1 %v2039_v26 }
 0x1c6   : > { %2043 = vmax.xlane.f32.xlu1 %v2042_v27  ;;  %v493_v27 = vrot.slane %v4158_v45, %v4128_v23 }
 0x1d4   : > { %v3172_v28 = vpop.f32.mrf.mxu1 }
 0x1d5   : > { %v2153_v32 = vmul.f32 0.0078125, %v3172_v28  ;;  %v3128_v28 = vld [vmem:[%s4341_s3 + $0x10] sm:$0xff] }
 0x1d6   : > { %v2143_v29 = vpop.f32.mrf.mxu1 }
 0x1d7   : > { %v2152_v30 = vmul.f32 0.0078125, %v2143_v29  ;;  %v2157_v36 = vsel %vm2038_vm0, %v2153_v32, -inf }
 0x1d9   : > { %v2154_v34 = vsel %vm2038_vm0, %v2152_v30, -inf }
 0x1da   : > { %2155 = vmax.xlane.f32.xlu0 %v2154_v34  ;;  %v501_v34 = vrot.slane %v4158_v45, %v468_v25 }
 0x1de   : > { %2158 = vmax.xlane.f32.xlu0 %v2157_v36  ;;  %v1735_v36 = vadd.f32 %v1734_v6, %v493_v27 }
 0x24b   : > { %v2041_v37 = vpop.xlane.xlu1 %2040 }
 0x24c   : > { %v2045_v38 = vsub.f32 %v2036_v33, %v2041_v37  ;;  %v2061_v37 = vld [vmem:[%s4341_s3] sm:$0xff] }
 0x24e   : > { %v2047_v46 = vmul.f32 1.442695, %v2045_v38 }
 0x24f   : > { %v2044_v41 = vpop.xlane.xlu1 %2043 }
 0x250   : > { %v2046_v47 = vsub.f32 %v2037_v22, %v2044_v41  ;;  %v3129_v41 = vld [vmem:[%s4341_s3 + $0x18] sm:$0xff] }
 0x252   : > { %v2049_v50 = vmul.f32 1.442695, %v2046_v47 }
 0x263   : > { %v2156_v42 = vpop.xlane.xlu0 %2155 }
 0x264   : > { %v2160_v44 = vsub.f32 %v2152_v30, %v2156_v42 }
 0x266   : > { %v2162_v48 = vmul.f32 1.442695, %v2160_v44  ;;  %v1731_v44 = vadd.f32 %v1730_v62, %v493_v27 }
 0x267   : > { %v2159_v49 = vpop.xlane.xlu0 %2158 }
 0x268   : > { %3455 = vpow2.f32 %v2162_v48  ;;  %v2161_v2 = vsub.f32 %v2153_v32, %v2159_v49  ;;  %v2062_v48 = vld [vmem:[%s4341_s3 + $0x8] sm:$0xff] }
 0x269   : > { %3457 = vpow2.f32 %v2047_v46  ;;  %v1778_v46 = vadd.f32 %v4175_v13, %v501_v34 }
 0x26a   : > { %v2164_v7 = vmul.f32 1.442695, %v2161_v2  ;;  %v1774_v2 = vadd.f32 %v4171_v8, %v501_v34  ;;  %v4236_v8 = vld [vmem:[%s4340_s2 + $0x10] sm:$0x3f] }
 0x26c   : > { %3459 = vpow2.f32 %v2164_v7 }
 0x26d   : > { %3461 = vpow2.f32 %v2049_v50  ;;  %v1816_v50 = vpop.f32.mrf.mxu0 }
 0x275   : > { %v3456_v51 = vpop.eup %3455 }
 0x276   : > { %v2166_v52 = vsel %vm2038_vm0, %v3456_v51, 0.0  ;;  %v3458_v53 = vpop.eup %3457 }
 0x277   : > { %2167 = vadd.xlane.f32.xlu0 %v2166_v52  ;;  %v2051_v59 = vsel %vm2038_vm0, %v3458_v53, 0.0 }
 0x279   : > { %v3460_v54 = vpop.eup %3459 }
 0x27a   : > { %v2169_v57 = vsel %vm2038_vm0, %v3460_v54, 0.0  ;;  %v3462_v60 = vpop.eup %3461 }
 0x27b   : > { %2170 = vadd.xlane.f32.xlu1 %v2169_v57  ;;  %2052 = vadd.xlane.f32.xlu0 %v2051_v59  ;;  %v2054_v61 = vsel %vm2038_vm0, %v3462_v60, 0.0 }
 0x27f   : > { %2055 = vadd.xlane.f32.xlu1 %v2054_v61 }
 0x300   : > { %v2168_v21 = vpop.xlane.xlu0 %2167 }
 0x301   : > { %3463 = vrcp.f32 %v2168_v21 }
 0x304   : > { %v2053_v3 = vpop.xlane.xlu0 %2052  ;;  %v2171_v22 = vpop.xlane.xlu1 %2170 }
 0x305   : > { %3465 = vrcp.f32 %v2053_v3 }
 0x306   : > { %3467 = vrcp.f32 %v2171_v22 }
 0x308   : > { %v2056_v33 = vpop.xlane.xlu1 %2055 }
 0x309   : > { %3469 = vrcp.f32 %v2056_v33 }
 0x30e   : > { %v3464_v26 = vpop.eup %3463 }
 0x30f   : > { %v2174_v29 = vmul.f32 %v3464_v26, %v3456_v51 }
 0x311   : > { %v2179_v30 = vadd.f32 %v3128_v28, %v2174_v29 }
 0x312   : > { %v3466_v32 = vpop.eup %3465 }
 0x313   : > { %v3468_v38 = vpop.eup %3467  ;;  %3130 = vmatmul.mubr.msk.f32.vlgmr.msra.gmra.mxu1 %vm2038_vm0, %v2179_v30  ;;  %v2059_v42 = vmul.f32 %v3466_v32, %v3458_v53 }
 0x314   : > { %2301 = vmatpush1.msra.mxu1 %v1735_v36  ;;  %2265 = vmatprep.mubr.f32.mxu1 %v3488_v14  ;;  %v2175_v63 = vmul.f32 %v3468_v38, %v3460_v54 }
 0x315   : > { %2302 = vmatprep.subr.mxu1 %v1733_v4  ;;  %v2063_v25 = vadd.f32 %v2061_v37, %v2059_v42 }
 0x316   : > { %v3470_v45 = vpop.eup %3469  ;;  %2303 = vmatpush1.msra.mxu1 %v1731_v44  ;;  %v2180_v47 = vadd.f32 %v3129_v41, %v2175_v63 }
 0x317   : > { %2383 = vmatprep.subr.mxu1 %v4153_v43  ;;  %3136 = vmatmul.mubr.msk.f32.vlgmr.msra.gmra.mxu0 %vm2038_vm0, %v2063_v25  ;;  %v2060_v49 = vmul.f32 %v3470_v45, %v3462_v60  ;;  %v1818_v43 = vpop.f32.mrf.mxu0 }
 0x318   : > { %3131 = vmatmul.mubr.msk.f32.gmra.mxu1 %vm2038_vm0, %v2180_v47  ;;  %2660 = vmatpush1.msra.mxu0 %v1778_v46  ;;  %v3138_v46 = vld [vmem:[%s4341_s3 + $0x20] sm:$0xff] }
 0x319   : > { %2661 = vmatprep.subr.mxu0 %v4173_v12  ;;  %2336 = vmatprep.mubr.f32.mxu1 %v3488_v14  ;;  %v2064_v13 = vadd.f32 %v2062_v48, %v2060_v49  ;;  %v1820_v12 = vpop.f32.mrf.mxu0 }
 0x31a   : > { %2662 = vmatpush1.msra.mxu0 %v1774_v2  ;;  %2502 = vmatprep.mubr.f32.mxu0 %v3488_v14  ;;  %v3139_v2 = vld [vmem:[%s4341_s3 + $0x28] sm:$0xff] }
 0x31b   : > { %3137 = vmatmul.mubr.msk.f32.gmra.mxu0 %vm2038_vm0, %v2064_v13 }
 0x31c   : > { %3132 = vmatmul.mubr.msk.f32.vlgmr.msra.gmra.mxu1 %vm2038_vm0, %v2179_v30  ;;  %2695 = vmatprep.mubr.f32.mxu0 %v3488_v14 }
 0x31d   : > { %2384 = vmatpush1.msra.mxu1 %v4150_v5  ;;  %2342 = vmatprep.mubr.f32.mxu1 %v3488_v14  ;;  %v513_v5 = vrot.slane %v4236_v8, %v4120_v10 }
 0x31e   : > { %2385 = vmatprep.subr.mxu1 %v4146_v39  ;;  %v1822_v39 = vpop.f32.mrf.mxu0 }
 0x31f   : > { %2386 = vmatpush1.msra.mxu1 %v4143_v35  ;;  %v509_v35 = vrot.slane %v4236_v8, %v4103_v58  ;;  %v1823_v7 = vadd.f32 %v1822_v39, %v513_v5  ;;  %v1819_v52 = vadd.f32 %v1818_v43, %v513_v5 }
 0x320   : > { %3173 = vmatprep.subr.mxu1 %v4122_v17  ;;  %3133 = vmatmul.mubr.msk.f32.gmra.mxu1 %vm2038_vm0, %v2180_v47 }
 0x321   : > { %2419 = vmatprep.mubr.f32.mxu1 %v3488_v14  ;;  %v1821_v51 = vadd.f32 %v1820_v12, %v509_v35  ;;  %v1817_v53 = vadd.f32 %v1816_v50, %v509_v35  ;;  %v1902_v50 = vpop.f32.mrf.mxu0 }
 0x323   : > { %v1904_v43 = vpop.f32.mrf.mxu0 }
 0x324   : > { %3134 = vmatmul.mubr.msk.f32.vlgmr.msra.gmra.mxu1 %vm2038_vm0, %v2063_v25 }
 0x325   : > { %3174 = vmatpush3.xpose.msra.mxu1 %v4122_v17  ;;  %2425 = vmatprep.mubr.f32.mxu1 %v3488_v14  ;;  %v1906_v12 = vpop.f32.mrf.mxu0 }
 0x326   : > { %3175 = vmatprep.subr.mxu1 %v4117_v9 }
 0x327   : > { %v4284_v5 = vpop.f32.mrf.mxu0 }
 0x328   : > { %3135 = vmatmul.mubr.msk.f32.gmra.mxu1 %vm2038_vm0, %v2064_v13 }
 0x329   : > { %3176 = vmatpush3.xpose.msra.mxu1 %v4117_v9  ;;  %3177 = vmatprep.mubr.f32.mxu1 %v4141_v31 }
 0x32a   : > { %2736 = vmatprep.subr.mxu1 %v1823_v7 }
 0x32c   : > { %3178 = vmatmul.mubr.f32.vlgmr.msra.gmra.mxu1 %v4148_v40 }
 0x32d   : > { %2737 = vmatpush1.msra.mxu1 %v1821_v51  ;;  %2772 = vmatprep.mubr.f32.mxu1 %v3488_v14  ;;  %v1955_v51 = vld [vmem:[%s4342_s4] sm:$0xf] }
 0x32e   : > { %2738 = vmatprep.subr.mxu1 %v1819_v52  ;;  %v517_v52 = vrot.slane %v4236_v8, %v4094_v55 }
 0x32f   : > { %2739 = vmatpush1.msra.mxu1 %v1817_v53  ;;  %v521_v53 = vrot.slane %v4236_v8, %v4097_v56 }
 0x3d3   : > { %v2261_v17 = vpop.f32.mrf.mxu1 }
 0x3d5   : > { %v2263_v54 = vpop.f32.mrf.mxu1 }
 0x3d7   : > { %v2498_v35 = vpop.f32.mrf.mxu0 }
 0x3d8   : > { %v2267_v57 = vpop.f32.mrf.mxu1 }
 0x3d9   : > { %v2500_v39 = vpop.f32.mrf.mxu0 }
 0x3da   : > { %v2269_v59 = vpop.f32.mrf.mxu1 }
 0x3db   : > { %v2504_v7 = vpop.f32.mrf.mxu0 }
 0x3dc   : > { %v4252_v60 = vpop.f32.mrf.mxu1 }
 0x3de   : > { %v4254_v9 = vpop.f32.mrf.mxu1 }
 0x3e0   : > { %v4256_v31 = vpop.f32.mrf.mxu1 }
 0x3e2   : > { %v4258_v61 = vpop.f32.mrf.mxu1 }
 0x3e4   : > { %v2421_v62 = vpop.f32.mrf.mxu1 }
 0x3e5   : > { %v4260_v0 = vadd.f32 %v2421_v62, %v2261_v17  ;;  %v2506_v17 = vpop.f32.mrf.mxu0  ;;  %v2813_v62 = vrot.slane %v1955_v51, %v4094_v55 }
 0x3e6   : > { %v2423_v40 = vpop.f32.mrf.mxu1 }
 0x3e7   : > { %v4262_v1 = vadd.f32 %v2423_v40, %v2263_v54  ;;  %v525_v54 = vrot.slane %v4236_v8, %v4128_v23  ;;  %v529_v40 = vrot.slane %v4236_v8, %v4131_v24  ;;  %v1862_v24 = vadd.f32 %v4179_v18, %v521_v53 }
 0x3e8   : > { %v2427_v4 = vpop.f32.mrf.mxu1 }
 0x3e9   : > { %v4264_v6 = vadd.f32 %v2427_v4, %v2267_v57  ;;  %v2499_v57 = vadd.f32 %v2498_v35, %v4252_v60  ;;  %v2501_v4 = vadd.f32 %v2500_v39, %v4254_v9  ;;  %v2809_v60 = vrot.slane %v1955_v51, %v4120_v10 }
 0x3ea   : > { %v2429_v11 = vpop.f32.mrf.mxu1 }
 0x3eb   : > { %v4266_v15 = vadd.f32 %v2429_v11, %v2269_v59  ;;  %v2805_v59 = vrot.slane %v1955_v51, %v4103_v58 }
 0x3ec   : > { %v3179_v21 = vpop.f32.mrf.mxu1 }
 0x3ed   : > { %v2589_v3 = vmul.f32 0.0078125, %v3179_v21 }
 0x3ee   : > { %v2579_v22 = vpop.f32.mrf.mxu1 }
 0x3ef   : > { %v2588_v33 = vmul.f32 0.0078125, %v2579_v22  ;;  %v2593_v26 = vsel %vm2038_vm0, %v2589_v3, -inf }
 0x3f0   : > { %2594 = vmax.xlane.f32.xlu1 %v2593_v26  ;;  %v2817_v26 = vrot.slane %v1955_v51, %v4097_v56  ;;  %v1866_v51 = vadd.f32 %v4183_v20, %v521_v53 }
 0x3f1   : > { %v2590_v27 = vsel %vm2038_vm0, %v2588_v33, -inf }
 0x3f2   : > { %2591 = vmax.xlane.f32.xlu0 %v2590_v27  ;;  %v1860_v27 = vadd.f32 %v4177_v16, %v517_v52  ;;  %v2505_v16 = vadd.f32 %v2504_v7, %v4256_v31 }
 0x479   : > { %v2595_v28 = vpop.xlane.xlu1 %2594 }
 0x47a   : > { %v2597_v29 = vsub.f32 %v2589_v3, %v2595_v28 }
 0x47b   : > { %v2592_v30 = vpop.xlane.xlu0 %2591 }
 0x47c   : > { %v2600_v32 = vmul.f32 1.442695, %v2597_v29  ;;  %v2596_v34 = vsub.f32 %v2588_v33, %v2592_v30 }
 0x47e   : > { %3471 = vpow2.f32 %v2600_v32  ;;  %v2598_v36 = vmul.f32 1.442695, %v2596_v34  ;;  %v1864_v32 = vadd.f32 %v4181_v19, %v517_v52  ;;  %v1903_v34 = vadd.f32 %v1902_v50, %v525_v54 }
 0x480   : > { %3473 = vpow2.f32 %v2598_v36  ;;  %v1905_v36 = vadd.f32 %v1904_v43, %v529_v40 }
 0x48b   : > { %v3472_v37 = vpop.eup %3471 }
 0x48c   : > { %v2605_v38 = vsel %vm2038_vm0, %v3472_v37, 0.0 }
 0x48d   : > { %v3474_v41 = vpop.eup %3473  ;;  %2606 = vadd.xlane.f32.xlu1 %v2605_v38 }
 0x48e   : > { %v2602_v42 = vsel %vm2038_vm0, %v3474_v41, 0.0 }
 0x48f   : > { %2603 = vadd.xlane.f32.xlu0 %v2602_v42 }
 0x516   : > { %v2607_v44 = vpop.xlane.xlu1 %2606 }
 0x517   : > { %3475 = vrcp.f32 %v2607_v44  ;;  %v1907_v44 = vadd.f32 %v1906_v12, %v525_v54 }
 0x518   : > { %v2604_v63 = vpop.xlane.xlu0 %2603 }
 0x519   : > { %3477 = vrcp.f32 %v2604_v63 }
 0x524   : > { %v3476_v25 = vpop.eup %3475 }
 0x525   : > { %v2611_v49 = vmul.f32 %v3476_v25, %v3472_v37 }
 0x526   : > { %v3478_v45 = vpop.eup %3477 }
 0x527   : > { %v2610_v47 = vmul.f32 %v3478_v45, %v3474_v41  ;;  %v2616_v13 = vadd.f32 %v3139_v2, %v2611_v49 }
 0x529   : > { %v2615_v48 = vadd.f32 %v3138_v46, %v2610_v47 }
 0x52b   : > { %3140 = vmatmul.mubr.msk.f32.vlgmr.msra.gmra.mxu0 %vm2038_vm0, %v2615_v48  ;;  %3142 = vmatmul.mubr.msk.f32.vlgmr.msra.gmra.mxu1 %vm2038_vm0, %v2615_v48 }
 0x52c   : > { %2701 = vmatprep.mubr.f32.mxu0 %v3488_v14  ;;  %2778 = vmatprep.mubr.f32.mxu1 %v3488_v14  ;;  %v1956_v14 = vld [vmem:[%s4343_s5] sm:$0xf] }
 0x52d   : > { %v2834_v21 = vrot.slane %v1956_v14, %v4103_v58  ;;  %v2842_v22 = vrot.slane %v1956_v14, %v4094_v55  ;;  %v2838_v9 = vrot.slane %v1956_v14, %v4120_v10  ;;  %v2846_v58 = vrot.slane %v1956_v14, %v4097_v56 }
 0x52e   : > { %v2507_v56 = vadd.f32 %v2506_v17, %v4258_v61  ;;  %v1909_v14 = vadd.f32 %v4284_v5, %v529_v40 }
 0x52f   : > { %3141 = vmatmul.mubr.msk.f32.gmra.mxu0 %vm2038_vm0, %v2616_v13  ;;  %3143 = vmatmul.mubr.msk.f32.gmra.mxu1 %vm2038_vm0, %v2616_v13 }
 0x5eb   : > { %v2697_v11 = vpop.f32.mrf.mxu0  ;;  %v2774_v3 = vpop.f32.mrf.mxu1 }
 0x5ec   : > { %v2785_v33 = vadd.f32 %v2697_v11, %v4260_v0  ;;  %v2787_v23 = vadd.f32 %v2774_v3, %v2499_v57 }
 0x5ed   : > { %v2699_v8 = vpop.f32.mrf.mxu0  ;;  %v2776_v28 = vpop.f32.mrf.mxu1 }
 0x5ee   : > { %v2822_v29 = vmul.f32 %v2805_v59, %v2785_v33  ;;  %v2824_v55 = vmul.f32 %v2813_v62, %v2787_v23  ;;  %v2786_v0 = vadd.f32 %v2699_v8, %v4262_v1  ;;  %v2788_v30 = vadd.f32 %v2776_v28, %v2501_v4 }
 0x5ef   : > { %v2703_v37 = vpop.f32.mrf.mxu0  ;;  %v2780_v38 = vpop.f32.mrf.mxu1 }
 0x5f0   : > { %v2851_v18 = vadd.f32 %v2834_v21, %v2822_v29  ;;  %v2853_v41 = vadd.f32 %v2842_v22, %v2824_v55  ;;  %v2823_v10 = vmul.f32 %v2809_v60, %v2786_v0  ;;  %v2825_v42 = vmul.f32 %v2817_v26, %v2788_v30 }
 0x5f1   : > { %v2789_v63 = vadd.f32 %v2703_v37, %v4264_v6  ;;  %v2791_v1 = vadd.f32 %v2780_v38, %v2505_v16  ;;  %v2705_v25 = vpop.f32.mrf.mxu0  ;;  %v2782_v45 = vpop.f32.mrf.mxu1 }
 0x5f2   : > { %v2859_v19 = vadd.f32 %v2851_v18, %v1860_v27  ;;  %v2861_v46 = vadd.f32 %v2853_v41, %v1903_v34  ;;  %v2852_v47 = vadd.f32 %v2838_v9, %v2823_v10  ;;  %v2854_v48 = vadd.f32 %v2846_v58, %v2825_v42 }
 0x5f3   : > { %v2826_v31 = vmul.f32 %v2805_v59, %v2789_v63  ;;  %v2828_v49 = vmul.f32 %v2813_v62, %v2791_v1  ;;  %v2790_v61 = vadd.f32 %v2705_v25, %v4266_v15  ;;  %v2792_v2 = vadd.f32 %v2782_v45, %v2507_v56 }
 0x5f4   : > { %v2867_v6 = vmax.f32 %v2859_v19, 0.0  ;;  %v2869_v13 = vmax.f32 %v2861_v46, 0.0  ;;  %v2860_v50 = vadd.f32 %v2852_v47, %v1862_v24  ;;  %v2862_v43 = vadd.f32 %v2854_v48, %v1905_v36 }
 0x5f5   : > { %v2855_v12 = vadd.f32 %v2834_v21, %v2826_v31  ;;  %v2857_v35 = vadd.f32 %v2842_v22, %v2828_v49  ;;  %v2827_v39 = vmul.f32 %v2809_v60, %v2790_v61  ;;  %v2829_v7 = vmul.f32 %v2817_v26, %v2792_v2 }
 0x5f6   : > { %2875 = vst [vmem:[%s4322_s13] sm:$0xff] %v2867_v6  ;;  %2877 = vst [vmem:[%s4322_s13 + $0x10] sm:$0xff] %v2869_v13  ;;  %v2868_v15 = vmax.f32 %v2860_v50, 0.0  ;;  %v2870_v52 = vmax.f32 %v2862_v43, 0.0 }
 0x5f7   : > { %v2863_v17 = vadd.f32 %v2855_v12, %v1864_v32  ;;  %v2865_v54 = vadd.f32 %v2857_v35, %v1907_v44  ;;  %v2856_v57 = vadd.f32 %v2838_v9, %v2827_v39  ;;  %v2858_v59 = vadd.f32 %v2846_v58, %v2829_v7 }
 0x5f8   : > { %2876 = vst [vmem:[%s4322_s13 + $0x8] sm:$0xff] %v2868_v15  ;;  %2878 = vst [vmem:[%s4322_s13 + $0x18] sm:$0xff] %v2870_v52 }
 0x5f9   : > { %v2871_v62 = vmax.f32 %v2863_v17, 0.0  ;;  %v2873_v4 = vmax.f32 %v2865_v54, 0.0  ;;  %v2864_v11 = vadd.f32 %v2856_v57, %v1866_v51  ;;  %v2866_v20 = vadd.f32 %v2858_v59, %v1909_v14 }
 0x5fb   : > { %2879 = vst [vmem:[%s4322_s13 + $0x20] sm:$0xff] %v2871_v62  ;;  %2881 = vst [vmem:[%s4322_s13 + $0x30] sm:$0xff] %v2873_v4  ;;  %v2872_v5 = vmax.f32 %v2864_v11, 0.0  ;;  %v2874_v53 = vmax.f32 %v2866_v20, 0.0 }
 0x5fd   : > { %2880 = vst [vmem:[%s4322_s13 + $0x28] sm:$0xff] %v2872_v5  ;;  %2882 = vst [vmem:[%s4322_s13 + $0x38] sm:$0xff] %v2874_v53 }
 0x5fe PF: > { %s16_s21 = sadd.s32 1, %s3485_s21  }
 0x5ff   : > { %p13_p4 = scmp.ge.s32.totalorder %s16_s21, 4  }
 0x601   :  { %15 = sbr.rel (!%p13_p4) target bundleno = 1 (0x1), region = 76 }

</bundles_post_ra>
